<compile_context>
chip_gen: v5e
topology: v5e:2x2
jax: 0.10.0
libtpu: 0.0.40
codegen_flags: <defaults>
</compile_context>

<pallas_src>
import math

import jax
import jax.numpy as jnp
from jax import lax
from jax.experimental import pallas as pl
from jax.experimental.pallas import tpu as pltpu


# --------------------------------------------------------------------------------------
# Single kernel: sequential decode recurrence + fused vocab projection.
# --------------------------------------------------------------------------------------
def decoder_kernel(hidden0_ref, ann_ref,
                   wa1s_ref, wa1a_ref, ba1_ref, wa2_ref,
                   wf1_ref, bf1_ref, wf2_ref, bf2_ref,
                   wg1_ref, bg1_ref, wg2_ref, bg2_ref,
                   wfc_ref, bfc_ref,
                   out_ref, y_slab_sc):
    B, N, A = ann_ref.shape
    H = hidden0_ref.shape[1]
    E = y_slab_sc.shape[1]
    T = y_slab_sc.shape[0] // B

    # ---- hoisted, time-invariant annotation projection (computed once) ----
    # NOTE: the (B, N, A) -> (B*N, A) reshape is layout-free because N is a multiple of
    # the 8-sublane tile here; if N stops being a sublane multiple it becomes a copy.
    ann = ann_ref[...]                                                   # [B, N, A]
    ann2 = ann.reshape(B * N, A)
    aproj = (jnp.dot(ann2, wa1a_ref[...], preferred_element_type=jnp.float32)
             .reshape(B, N, H) + ba1_ref[...][None])                     # [B, N, H]
    wa2_row = wa2_ref[...]                                               # [1, H]

    def step(t, carry):
        s, y_prev = carry

        # -- attention energies (uses pre-update s); ba2 dropped: softmax shift-invariant
        s_proj = jnp.dot(s, wa1s_ref[...], preferred_element_type=jnp.float32)   # [B, H]
        h1 = jnp.maximum(aproj + s_proj[:, None, :], 0.0)                         # [B, N, H]
        energy = jnp.sum(h1 * wa2_row[None], axis=-1)                             # [B, N]

        # -- stable softmax over annotations + context vector
        m = jnp.max(energy, axis=1, keepdims=True)
        w = jnp.exp(energy - m)
        w = w / jnp.sum(w, axis=1, keepdims=True)
        context = jnp.sum(ann * w[:, :, None], axis=1)                            # [B, 2H]

        # -- f: hidden-state update
        f1 = jnp.maximum(jnp.dot(s, wf1_ref[...], preferred_element_type=jnp.float32)
                         + bf1_ref[...], 0.0)
        h_new = jnp.dot(f1, wf2_ref[...], preferred_element_type=jnp.float32) + bf2_ref[...]

        # -- g: single lane-concatenated activation [y_prev | h_new | context]
        #    (E + 3H = 128 lanes here) -> one well-filled MXU push with combined Wg1
        cat = jnp.concatenate([y_prev, h_new, context], axis=-1)                  # [B, E+3H]
        g1 = jnp.maximum(jnp.dot(cat, wg1_ref[...], preferred_element_type=jnp.float32)
                         + bg1_ref[...], 0.0)
        y_new = jnp.dot(g1, wg2_ref[...], preferred_element_type=jnp.float32) + bg2_ref[...]

        # contiguous B-row store into the row-major [T*B, E] VMEM slab
        row = pl.multiple_of(t * B, B)
        y_slab_sc[pl.ds(row, B), :] = y_new
        return (h_new, y_new)

    s0 = hidden0_ref[...]
    y0 = jnp.zeros((B, E), jnp.float32)
    lax.fori_loop(0, T, step, (s0, y0), unroll=True)

    # ---- fused vocab projection: one batched [T*B, E] @ [E, V] matmul on the slab ----
    out_ref[...] = (jnp.dot(y_slab_sc[...], wfc_ref[...],
                            preferred_element_type=jnp.float32) + bfc_ref[...])


def attention_decoder_44(hidden_state, decode_length, annotations, params):
    B, H = hidden_state.shape
    _, N, A = annotations.shape
    E = params["wg2"].shape[1]
    V = params["wfc"].shape[1]
    T = decode_length

    # Split Wa1 into its s-part and annotation-part (exact decomposition of the concat);
    # flatten wa2 to a row for the VPU/XLU energy reduction.  ba2 is intentionally not
    # passed (constant shift under softmax).
    wa1s = params["wa1"][:H]                                             # [H, H]
    wa1a = params["wa1"][H:]                                             # [2H, H]
    wa2_row = params["wa2"].reshape(1, H)                                # [1, H]

    inputs = [hidden_state, annotations,
              wa1s, wa1a, params["ba1"], wa2_row,
              params["wf1"], params["bf1"], params["wf2"], params["bf2"],
              params["wg1"], params["bg1"], params["wg2"], params["bg2"],
              params["wfc"], params["bfc"]]

    def full_spec(shape):
        nd = len(shape)
        return pl.BlockSpec(shape, lambda i, nd=nd: (0,) * nd)

    logits_flat = pl.pallas_call(
        decoder_kernel,
        out_shape=jax.ShapeDtypeStruct((T * B, V), jnp.float32),
        grid=(1,),                                   # single step: recurrence loops in-kernel
        in_specs=[full_spec(x.shape) for x in inputs],
        out_specs=full_spec((T * B, V)),
        scratch_shapes=[pltpu.VMEM((T * B, E), jnp.float32)],   # resident pre-fc y slab
        compiler_params=pltpu.CompilerParams(dimension_semantics=("arbitrary",)),
    )(*inputs)

    # [T*B, V] -> [B, T, V] (cheap XLA-side relayout, outside the kernel)
    return logits_flat.reshape(T, B, V).transpose(1, 0, 2)


# --------------------------------------------------------------------------------------
# Plain-JAX replica of the PyTorch forward pass (correctness check).
# --------------------------------------------------------------------------------------
def reference_decoder(hidden_state, decode_length, annotations, p):
    B, H = hidden_state.shape
    N = annotations.shape[1]
    E = p["wg2"].shape[1]
    s = hidden_state
    y = jnp.zeros((B, E), jnp.float32)
    outs = []
    for _ in range(decode_length):
        y_prev = y
        # generate_context
        s_exp = jnp.broadcast_to(s[:, None, :], (B, N, H))
        cat = jnp.concatenate([s_exp, annotations], axis=-1)
        h1 = jax.nn.relu(cat @ p["wa1"] + p["ba1"])
        e = (h1 @ p["wa2"])[..., 0] + p["ba2"][0, 0]
        w = jax.nn.softmax(e, axis=1)
        c = jnp.sum(annotations * w[:, :, None], axis=1)
        # f
        s = jax.nn.relu(s @ p["wf1"] + p["bf1"]) @ p["wf2"] + p["bf2"]
        # g
        g1 = jax.nn.relu(jnp.concatenate([y_prev, s, c], axis=-1) @ p["wg1"] + p["bg1"])
        y = g1 @ p["wg2"] + p["bg2"]
        outs.append(y)
    out = jnp.stack(outs, axis=1)
    return out @ p["wfc"] + p["bfc"]


def init_params(key, E, H, V):
    """Deterministic PyTorch-default-style (uniform +-1/sqrt(fan_in)) init."""
    def linear(k, fan_in, fan_out):
        kw, kb = jax.random.split(k)
        bound = 1.0 / math.sqrt(fan_in)
        w = jax.random.uniform(kw, (fan_in, fan_out), jnp.float32, -bound, bound)
        b = jax.random.uniform(kb, (1, fan_out), jnp.float32, -bound, bound)
        return w, b

    ks = jax.random.split(key, 7)
    p = {}
    # Wa: Linear(3H, H) -> ReLU -> Linear(H, 1)
    p["wa1"], p["ba1"] = linear(ks[0], 3 * H, H)
    p["wa2"], p["ba2"] = linear(ks[1], H, 1)
    # Wf: Linear(H, H//2) -> ReLU -> Linear(H//2, H)
    p["wf1"], p["bf1"] = linear(ks[2], H, H // 2)
    p["wf2"], p["bf2"] = linear(ks[3], H // 2, H)
    # Wg: Linear(E + 3H, E//2) -> ReLU -> Linear(E//2, E)
    p["wg1"], p["bg1"] = linear(ks[4], E + 3 * H, E // 2)
    p["wg2"], p["bg2"] = linear(ks[5], E // 2, E)
    # fc: Linear(E, V)
    p["wfc"], p["bfc"] = linear(ks[6], E, V)
    return p


if __name__ == "__main__":
    B, H, E, N, T, V = 2, 32, 32, 8, 4, 64  # batch, hidden, embedding, annotations, decode_len, vocab

    key = jax.random.PRNGKey(0)
    k_par, k_hid, k_ann = jax.random.split(key, 3)
    params = init_params(k_par, E, H, V)
    hidden_state = jax.random.normal(k_hid, (B, H), jnp.float32)
    annotations = jax.random.normal(k_ann, (B, N, 2 * H), jnp.float32)

    out = attention_decoder_44(hidden_state, T, annotations, params)
    out = jax.block_until_ready(out)

    ref = reference_decoder(hidden_state, T, annotations, params)
    assert out.shape == (B, T, V), out.shape
    assert jnp.allclose(out, ref, atol=1e-4, rtol=1e-4), float(jnp.max(jnp.abs(out - ref)))

    print("KERNEL_OK")
</pallas_src>

<mosaic_0001>
module attributes {stable_mosaic.version = 11 : i64} {
  func.func @decoder_kernel(%arg0: i32, %arg1: memref<2x32xf32, #tpu.memory_space<vmem>>, %arg2: memref<2x8x64xf32, #tpu.memory_space<vmem>>, %arg3: memref<32x32xf32, #tpu.memory_space<vmem>>, %arg4: memref<64x32xf32, #tpu.memory_space<vmem>>, %arg5: memref<1x32xf32, #tpu.memory_space<vmem>>, %arg6: memref<1x32xf32, #tpu.memory_space<vmem>>, %arg7: memref<32x16xf32, #tpu.memory_space<vmem>>, %arg8: memref<1x16xf32, #tpu.memory_space<vmem>>, %arg9: memref<16x32xf32, #tpu.memory_space<vmem>>, %arg10: memref<1x32xf32, #tpu.memory_space<vmem>>, %arg11: memref<128x16xf32, #tpu.memory_space<vmem>>, %arg12: memref<1x16xf32, #tpu.memory_space<vmem>>, %arg13: memref<16x32xf32, #tpu.memory_space<vmem>>, %arg14: memref<1x32xf32, #tpu.memory_space<vmem>>, %arg15: memref<32x64xf32, #tpu.memory_space<vmem>>, %arg16: memref<1x64xf32, #tpu.memory_space<vmem>>, %arg17: memref<8x64xf32, #tpu.memory_space<vmem>>, %arg18: memref<8x32xf32, #tpu.memory_space<vmem>>) attributes {dimension_semantics = [#tpu.dimension_semantics<arbitrary>], iteration_bounds = array<i64: 1>, scalar_prefetch = 0 : i64, scratch_operands = 1 : i64, tpu.core_type = #tpu.core_type<tc>, window_params = [{pipeline_mode = #tpu.pipeline_mode<synchronous>, transform_indices = @transform_0, window_bounds = array<i64: 2, 32>}, {pipeline_mode = #tpu.pipeline_mode<synchronous>, transform_indices = @transform_1, window_bounds = array<i64: 2, 8, 64>}, {pipeline_mode = #tpu.pipeline_mode<synchronous>, transform_indices = @transform_2, window_bounds = array<i64: 32, 32>}, {pipeline_mode = #tpu.pipeline_mode<synchronous>, transform_indices = @transform_3, window_bounds = array<i64: 64, 32>}, {pipeline_mode = #tpu.pipeline_mode<synchronous>, transform_indices = @transform_4, window_bounds = array<i64: 1, 32>}, {pipeline_mode = #tpu.pipeline_mode<synchronous>, transform_indices = @transform_5, window_bounds = array<i64: 1, 32>}, {pipeline_mode = #tpu.pipeline_mode<synchronous>, transform_indices = @transform_6, window_bounds = array<i64: 32, 16>}, {pipeline_mode = #tpu.pipeline_mode<synchronous>, transform_indices = @transform_7, window_bounds = array<i64: 1, 16>}, {pipeline_mode = #tpu.pipeline_mode<synchronous>, transform_indices = @transform_8, window_bounds = array<i64: 16, 32>}, {pipeline_mode = #tpu.pipeline_mode<synchronous>, transform_indices = @transform_9, window_bounds = array<i64: 1, 32>}, {pipeline_mode = #tpu.pipeline_mode<synchronous>, transform_indices = @transform_10, window_bounds = array<i64: 128, 16>}, {pipeline_mode = #tpu.pipeline_mode<synchronous>, transform_indices = @transform_11, window_bounds = array<i64: 1, 16>}, {pipeline_mode = #tpu.pipeline_mode<synchronous>, transform_indices = @transform_12, window_bounds = array<i64: 16, 32>}, {pipeline_mode = #tpu.pipeline_mode<synchronous>, transform_indices = @transform_13, window_bounds = array<i64: 1, 32>}, {pipeline_mode = #tpu.pipeline_mode<synchronous>, transform_indices = @transform_14, window_bounds = array<i64: 32, 64>}, {pipeline_mode = #tpu.pipeline_mode<synchronous>, transform_indices = @transform_15, window_bounds = array<i64: 1, 64>}, {pipeline_mode = #tpu.pipeline_mode<synchronous>, transform_indices = @transform_16, window_bounds = array<i64: 8, 64>}]} {
    %c0 = arith.constant 0 : index
    %c0_0 = arith.constant 0 : index
    %c0_1 = arith.constant 0 : index
    %0 = vector.load %arg2[%c0, %c0_0, %c0_1] : memref<2x8x64xf32, #tpu.memory_space<vmem>>, vector<2x8x64xf32>
    %1 = vector.shape_cast %0 : vector<2x8x64xf32> to vector<16x64xf32>
    %c0_2 = arith.constant 0 : index
    %c0_3 = arith.constant 0 : index
    %2 = vector.load %arg4[%c0_2, %c0_3] : memref<64x32xf32, #tpu.memory_space<vmem>>, vector<64x32xf32>
    %cst = arith.constant dense<0.000000e+00> : vector<16x32xf32>
    %3 = tpu.matmul %1, %2, %cst {dimension_numbers = #tpu.dot_dimension_numbers<[1], [0], [0], [1], [0, 0, 1, 1], [], []>} : vector<16x64xf32>, vector<64x32xf32>, vector<16x32xf32> -> vector<16x32xf32>
    %4 = vector.shape_cast %3 : vector<16x32xf32> to vector<2x8x32xf32>
    %c0_4 = arith.constant 0 : index
    %c0_5 = arith.constant 0 : index
    %5 = vector.load %arg5[%c0_4, %c0_5] : memref<1x32xf32, #tpu.memory_space<vmem>>, vector<1x32xf32>
    %6 = vector.shape_cast %5 : vector<1x32xf32> to vector<1x1x32xf32>
    %7 = vector.broadcast %6 : vector<1x1x32xf32> to vector<2x8x32xf32>
    %8 = arith.addf %4, %7 : vector<2x8x32xf32>
    %c0_6 = arith.constant 0 : index
    %c0_7 = arith.constant 0 : index
    %9 = vector.load %arg6[%c0_6, %c0_7] : memref<1x32xf32, #tpu.memory_space<vmem>>, vector<1x32xf32>
    %c0_8 = arith.constant 0 : index
    %c0_9 = arith.constant 0 : index
    %10 = vector.load %arg1[%c0_8, %c0_9] : memref<2x32xf32, #tpu.memory_space<vmem>>, vector<2x32xf32>
    %cst_10 = arith.constant 0.000000e+00 : f32
    %11 = vector.broadcast %cst_10 : f32 to vector<2x32xf32>
    %c0_i32 = arith.constant 0 : i32
    %c0_11 = arith.constant 0 : index
    %c0_12 = arith.constant 0 : index
    %12 = vector.load %arg3[%c0_11, %c0_12] : memref<32x32xf32, #tpu.memory_space<vmem>>, vector<32x32xf32>
    %cst_13 = arith.constant dense<0.000000e+00> : vector<2x32xf32>
    %13 = tpu.matmul %10, %12, %cst_13 {dimension_numbers = #tpu.dot_dimension_numbers<[1], [0], [0], [1], [0, 0, 1, 1], [], []>} : vector<2x32xf32>, vector<32x32xf32>, vector<2x32xf32> -> vector<2x32xf32>
    %14 = vector.shape_cast %13 : vector<2x32xf32> to vector<2x1x32xf32>
    %15 = vector.broadcast %14 : vector<2x1x32xf32> to vector<2x8x32xf32>
    %16 = arith.addf %8, %15 : vector<2x8x32xf32>
    %cst_14 = arith.constant 0.000000e+00 : f32
    %17 = vector.broadcast %cst_14 : f32 to vector<2x8x32xf32>
    %18 = arith.maximumf %16, %17 : vector<2x8x32xf32>
    %19 = vector.shape_cast %9 : vector<1x32xf32> to vector<1x1x32xf32>
    %20 = vector.broadcast %19 : vector<1x1x32xf32> to vector<2x8x32xf32>
    %21 = arith.mulf %18, %20 : vector<2x8x32xf32>
    %cst_15 = arith.constant dense<0.000000e+00> : vector<2x8xf32>
    %22 = vector.multi_reduction <add>, %21, %cst_15 [2] : vector<2x8x32xf32> to vector<2x8xf32>
    %cst_16 = arith.constant dense<0xFF800000> : vector<2xf32>
    %23 = vector.multi_reduction <maximumf>, %22, %cst_16 [1] : vector<2x8xf32> to vector<2xf32>
    %24 = vector.shape_cast %23 : vector<2xf32> to vector<2x1xf32>
    %25 = vector.broadcast %24 : vector<2x1xf32> to vector<2x8xf32>
    %26 = arith.subf %22, %25 : vector<2x8xf32>
    %27 = math.exp %26 : vector<2x8xf32>
    %cst_17 = arith.constant dense<0.000000e+00> : vector<2xf32>
    %28 = vector.multi_reduction <add>, %27, %cst_17 [1] : vector<2x8xf32> to vector<2xf32>
    %29 = vector.shape_cast %28 : vector<2xf32> to vector<2x1xf32>
    %30 = vector.broadcast %29 : vector<2x1xf32> to vector<2x8xf32>
    %31 = arith.divf %27, %30 : vector<2x8xf32>
    %32 = vector.shape_cast %31 : vector<2x8xf32> to vector<2x8x1xf32>
    %33 = vector.broadcast %32 : vector<2x8x1xf32> to vector<2x8x64xf32>
    %34 = arith.mulf %0, %33 : vector<2x8x64xf32>
    %cst_18 = arith.constant dense<0.000000e+00> : vector<2x64xf32>
    %35 = vector.multi_reduction <add>, %34, %cst_18 [1] : vector<2x8x64xf32> to vector<2x64xf32>
    %c0_19 = arith.constant 0 : index
    %c0_20 = arith.constant 0 : index
    %36 = vector.load %arg7[%c0_19, %c0_20] : memref<32x16xf32, #tpu.memory_space<vmem>>, vector<32x16xf32>
    %cst_21 = arith.constant dense<0.000000e+00> : vector<2x16xf32>
    %37 = tpu.matmul %10, %36, %cst_21 {dimension_numbers = #tpu.dot_dimension_numbers<[1], [0], [0], [1], [0, 0, 1, 1], [], []>} : vector<2x32xf32>, vector<32x16xf32>, vector<2x16xf32> -> vector<2x16xf32>
    %c0_22 = arith.constant 0 : index
    %c0_23 = arith.constant 0 : index
    %38 = vector.load %arg8[%c0_22, %c0_23] : memref<1x16xf32, #tpu.memory_space<vmem>>, vector<1x16xf32>
    %39 = vector.broadcast %38 : vector<1x16xf32> to vector<2x16xf32>
    %40 = arith.addf %37, %39 : vector<2x16xf32>
    %cst_24 = arith.constant 0.000000e+00 : f32
    %41 = vector.broadcast %cst_24 : f32 to vector<2x16xf32>
    %42 = arith.maximumf %40, %41 : vector<2x16xf32>
    %c0_25 = arith.constant 0 : index
    %c0_26 = arith.constant 0 : index
    %43 = vector.load %arg9[%c0_25, %c0_26] : memref<16x32xf32, #tpu.memory_space<vmem>>, vector<16x32xf32>
    %cst_27 = arith.constant dense<0.000000e+00> : vector<2x32xf32>
    %44 = tpu.matmul %42, %43, %cst_27 {dimension_numbers = #tpu.dot_dimension_numbers<[1], [0], [0], [1], [0, 0, 1, 1], [], []>} : vector<2x16xf32>, vector<16x32xf32>, vector<2x32xf32> -> vector<2x32xf32>
    %c0_28 = arith.constant 0 : index
    %c0_29 = arith.constant 0 : index
    %45 = vector.load %arg10[%c0_28, %c0_29] : memref<1x32xf32, #tpu.memory_space<vmem>>, vector<1x32xf32>
    %46 = vector.broadcast %45 : vector<1x32xf32> to vector<2x32xf32>
    %47 = arith.addf %44, %46 : vector<2x32xf32>
    %48 = tpu.concatenate %11, %47, %35 in 1 : vector<2x32xf32>, vector<2x32xf32>, vector<2x64xf32> -> vector<2x128xf32>
    %c0_30 = arith.constant 0 : index
    %c0_31 = arith.constant 0 : index
    %49 = vector.load %arg11[%c0_30, %c0_31] : memref<128x16xf32, #tpu.memory_space<vmem>>, vector<128x16xf32>
    %cst_32 = arith.constant dense<0.000000e+00> : vector<2x16xf32>
    %50 = tpu.matmul %48, %49, %cst_32 {dimension_numbers = #tpu.dot_dimension_numbers<[1], [0], [0], [1], [0, 0, 1, 1], [], []>} : vector<2x128xf32>, vector<128x16xf32>, vector<2x16xf32> -> vector<2x16xf32>
    %c0_33 = arith.constant 0 : index
    %c0_34 = arith.constant 0 : index
    %51 = vector.load %arg12[%c0_33, %c0_34] : memref<1x16xf32, #tpu.memory_space<vmem>>, vector<1x16xf32>
    %52 = vector.broadcast %51 : vector<1x16xf32> to vector<2x16xf32>
    %53 = arith.addf %50, %52 : vector<2x16xf32>
    %cst_35 = arith.constant 0.000000e+00 : f32
    %54 = vector.broadcast %cst_35 : f32 to vector<2x16xf32>
    %55 = arith.maximumf %53, %54 : vector<2x16xf32>
    %c0_36 = arith.constant 0 : index
    %c0_37 = arith.constant 0 : index
    %56 = vector.load %arg13[%c0_36, %c0_37] : memref<16x32xf32, #tpu.memory_space<vmem>>, vector<16x32xf32>
    %cst_38 = arith.constant dense<0.000000e+00> : vector<2x32xf32>
    %57 = tpu.matmul %55, %56, %cst_38 {dimension_numbers = #tpu.dot_dimension_numbers<[1], [0], [0], [1], [0, 0, 1, 1], [], []>} : vector<2x16xf32>, vector<16x32xf32>, vector<2x32xf32> -> vector<2x32xf32>
    %c0_39 = arith.constant 0 : index
    %c0_40 = arith.constant 0 : index
    %58 = vector.load %arg14[%c0_39, %c0_40] : memref<1x32xf32, #tpu.memory_space<vmem>>, vector<1x32xf32>
    %59 = vector.broadcast %58 : vector<1x32xf32> to vector<2x32xf32>
    %60 = arith.addf %57, %59 : vector<2x32xf32>
    %c2_i32 = arith.constant 2 : i32
    %61 = arith.muli %c0_i32, %c2_i32 : i32
    %62 = tpu.assume_multiple %61, 2 : i32
    %63 = arith.index_cast %62 : i32 to index
    %c0_41 = arith.constant 0 : index
    %64 = vector.load %arg18[%63, %c0_41] : memref<8x32xf32, #tpu.memory_space<vmem>>, vector<2x32xf32>
    tpu.vector_store %arg18[%63, %c0_41], %60 {strides = array<i32>} : memref<8x32xf32, #tpu.memory_space<vmem>>, vector<2x32xf32>,
    %c1_i32 = arith.constant 1 : i32
    %c0_42 = arith.constant 0 : index
    %c0_43 = arith.constant 0 : index
    %65 = vector.load %arg3[%c0_42, %c0_43] : memref<32x32xf32, #tpu.memory_space<vmem>>, vector<32x32xf32>
    %cst_44 = arith.constant dense<0.000000e+00> : vector<2x32xf32>
    %66 = tpu.matmul %47, %65, %cst_44 {dimension_numbers = #tpu.dot_dimension_numbers<[1], [0], [0], [1], [0, 0, 1, 1], [], []>} : vector<2x32xf32>, vector<32x32xf32>, vector<2x32xf32> -> vector<2x32xf32>
    %67 = vector.shape_cast %66 : vector<2x32xf32> to vector<2x1x32xf32>
    %68 = vector.broadcast %67 : vector<2x1x32xf32> to vector<2x8x32xf32>
    %69 = arith.addf %8, %68 : vector<2x8x32xf32>
    %cst_45 = arith.constant 0.000000e+00 : f32
    %70 = vector.broadcast %cst_45 : f32 to vector<2x8x32xf32>
    %71 = arith.maximumf %69, %70 : vector<2x8x32xf32>
    %72 = vector.shape_cast %9 : vector<1x32xf32> to vector<1x1x32xf32>
    %73 = vector.broadcast %72 : vector<1x1x32xf32> to vector<2x8x32xf32>
    %74 = arith.mulf %71, %73 : vector<2x8x32xf32>
    %cst_46 = arith.constant dense<0.000000e+00> : vector<2x8xf32>
    %75 = vector.multi_reduction <add>, %74, %cst_46 [2] : vector<2x8x32xf32> to vector<2x8xf32>
    %cst_47 = arith.constant dense<0xFF800000> : vector<2xf32>
    %76 = vector.multi_reduction <maximumf>, %75, %cst_47 [1] : vector<2x8xf32> to vector<2xf32>
    %77 = vector.shape_cast %76 : vector<2xf32> to vector<2x1xf32>
    %78 = vector.broadcast %77 : vector<2x1xf32> to vector<2x8xf32>
    %79 = arith.subf %75, %78 : vector<2x8xf32>
    %80 = math.exp %79 : vector<2x8xf32>
    %cst_48 = arith.constant dense<0.000000e+00> : vector<2xf32>
    %81 = vector.multi_reduction <add>, %80, %cst_48 [1] : vector<2x8xf32> to vector<2xf32>
    %82 = vector.shape_cast %81 : vector<2xf32> to vector<2x1xf32>
    %83 = vector.broadcast %82 : vector<2x1xf32> to vector<2x8xf32>
    %84 = arith.divf %80, %83 : vector<2x8xf32>
    %85 = vector.shape_cast %84 : vector<2x8xf32> to vector<2x8x1xf32>
    %86 = vector.broadcast %85 : vector<2x8x1xf32> to vector<2x8x64xf32>
    %87 = arith.mulf %0, %86 : vector<2x8x64xf32>
    %cst_49 = arith.constant dense<0.000000e+00> : vector<2x64xf32>
    %88 = vector.multi_reduction <add>, %87, %cst_49 [1] : vector<2x8x64xf32> to vector<2x64xf32>
    %c0_50 = arith.constant 0 : index
    %c0_51 = arith.constant 0 : index
    %89 = vector.load %arg7[%c0_50, %c0_51] : memref<32x16xf32, #tpu.memory_space<vmem>>, vector<32x16xf32>
    %cst_52 = arith.constant dense<0.000000e+00> : vector<2x16xf32>
    %90 = tpu.matmul %47, %89, %cst_52 {dimension_numbers = #tpu.dot_dimension_numbers<[1], [0], [0], [1], [0, 0, 1, 1], [], []>} : vector<2x32xf32>, vector<32x16xf32>, vector<2x16xf32> -> vector<2x16xf32>
    %c0_53 = arith.constant 0 : index
    %c0_54 = arith.constant 0 : index
    %91 = vector.load %arg8[%c0_53, %c0_54] : memref<1x16xf32, #tpu.memory_space<vmem>>, vector<1x16xf32>
    %92 = vector.broadcast %91 : vector<1x16xf32> to vector<2x16xf32>
    %93 = arith.addf %90, %92 : vector<2x16xf32>
    %cst_55 = arith.constant 0.000000e+00 : f32
    %94 = vector.broadcast %cst_55 : f32 to vector<2x16xf32>
    %95 = arith.maximumf %93, %94 : vector<2x16xf32>
    %c0_56 = arith.constant 0 : index
    %c0_57 = arith.constant 0 : index
    %96 = vector.load %arg9[%c0_56, %c0_57] : memref<16x32xf32, #tpu.memory_space<vmem>>, vector<16x32xf32>
    %cst_58 = arith.constant dense<0.000000e+00> : vector<2x32xf32>
    %97 = tpu.matmul %95, %96, %cst_58 {dimension_numbers = #tpu.dot_dimension_numbers<[1], [0], [0], [1], [0, 0, 1, 1], [], []>} : vector<2x16xf32>, vector<16x32xf32>, vector<2x32xf32> -> vector<2x32xf32>
    %c0_59 = arith.constant 0 : index
    %c0_60 = arith.constant 0 : index
    %98 = vector.load %arg10[%c0_59, %c0_60] : memref<1x32xf32, #tpu.memory_space<vmem>>, vector<1x32xf32>
    %99 = vector.broadcast %98 : vector<1x32xf32> to vector<2x32xf32>
    %100 = arith.addf %97, %99 : vector<2x32xf32>
    %101 = tpu.concatenate %60, %100, %88 in 1 : vector<2x32xf32>, vector<2x32xf32>, vector<2x64xf32> -> vector<2x128xf32>
    %c0_61 = arith.constant 0 : index
    %c0_62 = arith.constant 0 : index
    %102 = vector.load %arg11[%c0_61, %c0_62] : memref<128x16xf32, #tpu.memory_space<vmem>>, vector<128x16xf32>
    %cst_63 = arith.constant dense<0.000000e+00> : vector<2x16xf32>
    %103 = tpu.matmul %101, %102, %cst_63 {dimension_numbers = #tpu.dot_dimension_numbers<[1], [0], [0], [1], [0, 0, 1, 1], [], []>} : vector<2x128xf32>, vector<128x16xf32>, vector<2x16xf32> -> vector<2x16xf32>
    %c0_64 = arith.constant 0 : index
    %c0_65 = arith.constant 0 : index
    %104 = vector.load %arg12[%c0_64, %c0_65] : memref<1x16xf32, #tpu.memory_space<vmem>>, vector<1x16xf32>
    %105 = vector.broadcast %104 : vector<1x16xf32> to vector<2x16xf32>
    %106 = arith.addf %103, %105 : vector<2x16xf32>
    %cst_66 = arith.constant 0.000000e+00 : f32
    %107 = vector.broadcast %cst_66 : f32 to vector<2x16xf32>
    %108 = arith.maximumf %106, %107 : vector<2x16xf32>
    %c0_67 = arith.constant 0 : index
    %c0_68 = arith.constant 0 : index
    %109 = vector.load %arg13[%c0_67, %c0_68] : memref<16x32xf32, #tpu.memory_space<vmem>>, vector<16x32xf32>
    %cst_69 = arith.constant dense<0.000000e+00> : vector<2x32xf32>
    %110 = tpu.matmul %108, %109, %cst_69 {dimension_numbers = #tpu.dot_dimension_numbers<[1], [0], [0], [1], [0, 0, 1, 1], [], []>} : vector<2x16xf32>, vector<16x32xf32>, vector<2x32xf32> -> vector<2x32xf32>
    %c0_70 = arith.constant 0 : index
    %c0_71 = arith.constant 0 : index
    %111 = vector.load %arg14[%c0_70, %c0_71] : memref<1x32xf32, #tpu.memory_space<vmem>>, vector<1x32xf32>
    %112 = vector.broadcast %111 : vector<1x32xf32> to vector<2x32xf32>
    %113 = arith.addf %110, %112 : vector<2x32xf32>
    %c2_i32_72 = arith.constant 2 : i32
    %114 = arith.muli %c1_i32, %c2_i32_72 : i32
    %115 = tpu.assume_multiple %114, 2 : i32
    %116 = arith.index_cast %115 : i32 to index
    %c0_73 = arith.constant 0 : index
    %117 = vector.load %arg18[%116, %c0_73] : memref<8x32xf32, #tpu.memory_space<vmem>>, vector<2x32xf32>
    tpu.vector_store %arg18[%116, %c0_73], %113 {strides = array<i32>} : memref<8x32xf32, #tpu.memory_space<vmem>>, vector<2x32xf32>,
    %c2_i32_74 = arith.constant 2 : i32
    %c0_75 = arith.constant 0 : index
    %c0_76 = arith.constant 0 : index
    %118 = vector.load %arg3[%c0_75, %c0_76] : memref<32x32xf32, #tpu.memory_space<vmem>>, vector<32x32xf32>
    %cst_77 = arith.constant dense<0.000000e+00> : vector<2x32xf32>
    %119 = tpu.matmul %100, %118, %cst_77 {dimension_numbers = #tpu.dot_dimension_numbers<[1], [0], [0], [1], [0, 0, 1, 1], [], []>} : vector<2x32xf32>, vector<32x32xf32>, vector<2x32xf32> -> vector<2x32xf32>
    %120 = vector.shape_cast %119 : vector<2x32xf32> to vector<2x1x32xf32>
    %121 = vector.broadcast %120 : vector<2x1x32xf32> to vector<2x8x32xf32>
    %122 = arith.addf %8, %121 : vector<2x8x32xf32>
    %cst_78 = arith.constant 0.000000e+00 : f32
    %123 = vector.broadcast %cst_78 : f32 to vector<2x8x32xf32>
    %124 = arith.maximumf %122, %123 : vector<2x8x32xf32>
    %125 = vector.shape_cast %9 : vector<1x32xf32> to vector<1x1x32xf32>
    %126 = vector.broadcast %125 : vector<1x1x32xf32> to vector<2x8x32xf32>
    %127 = arith.mulf %124, %126 : vector<2x8x32xf32>
    %cst_79 = arith.constant dense<0.000000e+00> : vector<2x8xf32>
    %128 = vector.multi_reduction <add>, %127, %cst_79 [2] : vector<2x8x32xf32> to vector<2x8xf32>
    %cst_80 = arith.constant dense<0xFF800000> : vector<2xf32>
    %129 = vector.multi_reduction <maximumf>, %128, %cst_80 [1] : vector<2x8xf32> to vector<2xf32>
    %130 = vector.shape_cast %129 : vector<2xf32> to vector<2x1xf32>
    %131 = vector.broadcast %130 : vector<2x1xf32> to vector<2x8xf32>
    %132 = arith.subf %128, %131 : vector<2x8xf32>
    %133 = math.exp %132 : vector<2x8xf32>
    %cst_81 = arith.constant dense<0.000000e+00> : vector<2xf32>
    %134 = vector.multi_reduction <add>, %133, %cst_81 [1] : vector<2x8xf32> to vector<2xf32>
    %135 = vector.shape_cast %134 : vector<2xf32> to vector<2x1xf32>
    %136 = vector.broadcast %135 : vector<2x1xf32> to vector<2x8xf32>
    %137 = arith.divf %133, %136 : vector<2x8xf32>
    %138 = vector.shape_cast %137 : vector<2x8xf32> to vector<2x8x1xf32>
    %139 = vector.broadcast %138 : vector<2x8x1xf32> to vector<2x8x64xf32>
    %140 = arith.mulf %0, %139 : vector<2x8x64xf32>
    %cst_82 = arith.constant dense<0.000000e+00> : vector<2x64xf32>
    %141 = vector.multi_reduction <add>, %140, %cst_82 [1] : vector<2x8x64xf32> to vector<2x64xf32>
    %c0_83 = arith.constant 0 : index
    %c0_84 = arith.constant 0 : index
    %142 = vector.load %arg7[%c0_83, %c0_84] : memref<32x16xf32, #tpu.memory_space<vmem>>, vector<32x16xf32>
    %cst_85 = arith.constant dense<0.000000e+00> : vector<2x16xf32>
    %143 = tpu.matmul %100, %142, %cst_85 {dimension_numbers = #tpu.dot_dimension_numbers<[1], [0], [0], [1], [0, 0, 1, 1], [], []>} : vector<2x32xf32>, vector<32x16xf32>, vector<2x16xf32> -> vector<2x16xf32>
    %c0_86 = arith.constant 0 : index
    %c0_87 = arith.constant 0 : index
    %144 = vector.load %arg8[%c0_86, %c0_87] : memref<1x16xf32, #tpu.memory_space<vmem>>, vector<1x16xf32>
    %145 = vector.broadcast %144 : vector<1x16xf32> to vector<2x16xf32>
    %146 = arith.addf %143, %145 : vector<2x16xf32>
    %cst_88 = arith.constant 0.000000e+00 : f32
    %147 = vector.broadcast %cst_88 : f32 to vector<2x16xf32>
    %148 = arith.maximumf %146, %147 : vector<2x16xf32>
    %c0_89 = arith.constant 0 : index
    %c0_90 = arith.constant 0 : index
    %149 = vector.load %arg9[%c0_89, %c0_90] : memref<16x32xf32, #tpu.memory_space<vmem>>, vector<16x32xf32>
    %cst_91 = arith.constant dense<0.000000e+00> : vector<2x32xf32>
    %150 = tpu.matmul %148, %149, %cst_91 {dimension_numbers = #tpu.dot_dimension_numbers<[1], [0], [0], [1], [0, 0, 1, 1], [], []>} : vector<2x16xf32>, vector<16x32xf32>, vector<2x32xf32> -> vector<2x32xf32>
    %c0_92 = arith.constant 0 : index
    %c0_93 = arith.constant 0 : index
    %151 = vector.load %arg10[%c0_92, %c0_93] : memref<1x32xf32, #tpu.memory_space<vmem>>, vector<1x32xf32>
    %152 = vector.broadcast %151 : vector<1x32xf32> to vector<2x32xf32>
    %153 = arith.addf %150, %152 : vector<2x32xf32>
    %154 = tpu.concatenate %113, %153, %141 in 1 : vector<2x32xf32>, vector<2x32xf32>, vector<2x64xf32> -> vector<2x128xf32>
    %c0_94 = arith.constant 0 : index
    %c0_95 = arith.constant 0 : index
    %155 = vector.load %arg11[%c0_94, %c0_95] : memref<128x16xf32, #tpu.memory_space<vmem>>, vector<128x16xf32>
    %cst_96 = arith.constant dense<0.000000e+00> : vector<2x16xf32>
    %156 = tpu.matmul %154, %155, %cst_96 {dimension_numbers = #tpu.dot_dimension_numbers<[1], [0], [0], [1], [0, 0, 1, 1], [], []>} : vector<2x128xf32>, vector<128x16xf32>, vector<2x16xf32> -> vector<2x16xf32>
    %c0_97 = arith.constant 0 : index
    %c0_98 = arith.constant 0 : index
    %157 = vector.load %arg12[%c0_97, %c0_98] : memref<1x16xf32, #tpu.memory_space<vmem>>, vector<1x16xf32>
    %158 = vector.broadcast %157 : vector<1x16xf32> to vector<2x16xf32>
    %159 = arith.addf %156, %158 : vector<2x16xf32>
    %cst_99 = arith.constant 0.000000e+00 : f32
    %160 = vector.broadcast %cst_99 : f32 to vector<2x16xf32>
    %161 = arith.maximumf %159, %160 : vector<2x16xf32>
    %c0_100 = arith.constant 0 : index
    %c0_101 = arith.constant 0 : index
    %162 = vector.load %arg13[%c0_100, %c0_101] : memref<16x32xf32, #tpu.memory_space<vmem>>, vector<16x32xf32>
    %cst_102 = arith.constant dense<0.000000e+00> : vector<2x32xf32>
    %163 = tpu.matmul %161, %162, %cst_102 {dimension_numbers = #tpu.dot_dimension_numbers<[1], [0], [0], [1], [0, 0, 1, 1], [], []>} : vector<2x16xf32>, vector<16x32xf32>, vector<2x32xf32> -> vector<2x32xf32>
    %c0_103 = arith.constant 0 : index
    %c0_104 = arith.constant 0 : index
    %164 = vector.load %arg14[%c0_103, %c0_104] : memref<1x32xf32, #tpu.memory_space<vmem>>, vector<1x32xf32>
    %165 = vector.broadcast %164 : vector<1x32xf32> to vector<2x32xf32>
    %166 = arith.addf %163, %165 : vector<2x32xf32>
    %c2_i32_105 = arith.constant 2 : i32
    %167 = arith.muli %c2_i32_74, %c2_i32_105 : i32
    %168 = tpu.assume_multiple %167, 2 : i32
    %169 = arith.index_cast %168 : i32 to index
    %c0_106 = arith.constant 0 : index
    %170 = vector.load %arg18[%169, %c0_106] : memref<8x32xf32, #tpu.memory_space<vmem>>, vector<2x32xf32>
    tpu.vector_store %arg18[%169, %c0_106], %166 {strides = array<i32>} : memref<8x32xf32, #tpu.memory_space<vmem>>, vector<2x32xf32>,
    %c3_i32 = arith.constant 3 : i32
    %c0_107 = arith.constant 0 : index
    %c0_108 = arith.constant 0 : index
    %171 = vector.load %arg3[%c0_107, %c0_108] : memref<32x32xf32, #tpu.memory_space<vmem>>, vector<32x32xf32>
    %cst_109 = arith.constant dense<0.000000e+00> : vector<2x32xf32>
    %172 = tpu.matmul %153, %171, %cst_109 {dimension_numbers = #tpu.dot_dimension_numbers<[1], [0], [0], [1], [0, 0, 1, 1], [], []>} : vector<2x32xf32>, vector<32x32xf32>, vector<2x32xf32> -> vector<2x32xf32>
    %173 = vector.shape_cast %172 : vector<2x32xf32> to vector<2x1x32xf32>
    %174 = vector.broadcast %173 : vector<2x1x32xf32> to vector<2x8x32xf32>
    %175 = arith.addf %8, %174 : vector<2x8x32xf32>
    %cst_110 = arith.constant 0.000000e+00 : f32
    %176 = vector.broadcast %cst_110 : f32 to vector<2x8x32xf32>
    %177 = arith.maximumf %175, %176 : vector<2x8x32xf32>
    %178 = vector.shape_cast %9 : vector<1x32xf32> to vector<1x1x32xf32>
    %179 = vector.broadcast %178 : vector<1x1x32xf32> to vector<2x8x32xf32>
    %180 = arith.mulf %177, %179 : vector<2x8x32xf32>
    %cst_111 = arith.constant dense<0.000000e+00> : vector<2x8xf32>
    %181 = vector.multi_reduction <add>, %180, %cst_111 [2] : vector<2x8x32xf32> to vector<2x8xf32>
    %cst_112 = arith.constant dense<0xFF800000> : vector<2xf32>
    %182 = vector.multi_reduction <maximumf>, %181, %cst_112 [1] : vector<2x8xf32> to vector<2xf32>
    %183 = vector.shape_cast %182 : vector<2xf32> to vector<2x1xf32>
    %184 = vector.broadcast %183 : vector<2x1xf32> to vector<2x8xf32>
    %185 = arith.subf %181, %184 : vector<2x8xf32>
    %186 = math.exp %185 : vector<2x8xf32>
    %cst_113 = arith.constant dense<0.000000e+00> : vector<2xf32>
    %187 = vector.multi_reduction <add>, %186, %cst_113 [1] : vector<2x8xf32> to vector<2xf32>
    %188 = vector.shape_cast %187 : vector<2xf32> to vector<2x1xf32>
    %189 = vector.broadcast %188 : vector<2x1xf32> to vector<2x8xf32>
    %190 = arith.divf %186, %189 : vector<2x8xf32>
    %191 = vector.shape_cast %190 : vector<2x8xf32> to vector<2x8x1xf32>
    %192 = vector.broadcast %191 : vector<2x8x1xf32> to vector<2x8x64xf32>
    %193 = arith.mulf %0, %192 : vector<2x8x64xf32>
    %cst_114 = arith.constant dense<0.000000e+00> : vector<2x64xf32>
    %194 = vector.multi_reduction <add>, %193, %cst_114 [1] : vector<2x8x64xf32> to vector<2x64xf32>
    %c0_115 = arith.constant 0 : index
    %c0_116 = arith.constant 0 : index
    %195 = vector.load %arg7[%c0_115, %c0_116] : memref<32x16xf32, #tpu.memory_space<vmem>>, vector<32x16xf32>
    %cst_117 = arith.constant dense<0.000000e+00> : vector<2x16xf32>
    %196 = tpu.matmul %153, %195, %cst_117 {dimension_numbers = #tpu.dot_dimension_numbers<[1], [0], [0], [1], [0, 0, 1, 1], [], []>} : vector<2x32xf32>, vector<32x16xf32>, vector<2x16xf32> -> vector<2x16xf32>
    %c0_118 = arith.constant 0 : index
    %c0_119 = arith.constant 0 : index
    %197 = vector.load %arg8[%c0_118, %c0_119] : memref<1x16xf32, #tpu.memory_space<vmem>>, vector<1x16xf32>
    %198 = vector.broadcast %197 : vector<1x16xf32> to vector<2x16xf32>
    %199 = arith.addf %196, %198 : vector<2x16xf32>
    %cst_120 = arith.constant 0.000000e+00 : f32
    %200 = vector.broadcast %cst_120 : f32 to vector<2x16xf32>
    %201 = arith.maximumf %199, %200 : vector<2x16xf32>
    %c0_121 = arith.constant 0 : index
    %c0_122 = arith.constant 0 : index
    %202 = vector.load %arg9[%c0_121, %c0_122] : memref<16x32xf32, #tpu.memory_space<vmem>>, vector<16x32xf32>
    %cst_123 = arith.constant dense<0.000000e+00> : vector<2x32xf32>
    %203 = tpu.matmul %201, %202, %cst_123 {dimension_numbers = #tpu.dot_dimension_numbers<[1], [0], [0], [1], [0, 0, 1, 1], [], []>} : vector<2x16xf32>, vector<16x32xf32>, vector<2x32xf32> -> vector<2x32xf32>
    %c0_124 = arith.constant 0 : index
    %c0_125 = arith.constant 0 : index
    %204 = vector.load %arg10[%c0_124, %c0_125] : memref<1x32xf32, #tpu.memory_space<vmem>>, vector<1x32xf32>
    %205 = vector.broadcast %204 : vector<1x32xf32> to vector<2x32xf32>
    %206 = arith.addf %203, %205 : vector<2x32xf32>
    %207 = tpu.concatenate %166, %206, %194 in 1 : vector<2x32xf32>, vector<2x32xf32>, vector<2x64xf32> -> vector<2x128xf32>
    %c0_126 = arith.constant 0 : index
    %c0_127 = arith.constant 0 : index
    %208 = vector.load %arg11[%c0_126, %c0_127] : memref<128x16xf32, #tpu.memory_space<vmem>>, vector<128x16xf32>
    %cst_128 = arith.constant dense<0.000000e+00> : vector<2x16xf32>
    %209 = tpu.matmul %207, %208, %cst_128 {dimension_numbers = #tpu.dot_dimension_numbers<[1], [0], [0], [1], [0, 0, 1, 1], [], []>} : vector<2x128xf32>, vector<128x16xf32>, vector<2x16xf32> -> vector<2x16xf32>
    %c0_129 = arith.constant 0 : index
    %c0_130 = arith.constant 0 : index
    %210 = vector.load %arg12[%c0_129, %c0_130] : memref<1x16xf32, #tpu.memory_space<vmem>>, vector<1x16xf32>
    %211 = vector.broadcast %210 : vector<1x16xf32> to vector<2x16xf32>
    %212 = arith.addf %209, %211 : vector<2x16xf32>
    %cst_131 = arith.constant 0.000000e+00 : f32
    %213 = vector.broadcast %cst_131 : f32 to vector<2x16xf32>
    %214 = arith.maximumf %212, %213 : vector<2x16xf32>
    %c0_132 = arith.constant 0 : index
    %c0_133 = arith.constant 0 : index
    %215 = vector.load %arg13[%c0_132, %c0_133] : memref<16x32xf32, #tpu.memory_space<vmem>>, vector<16x32xf32>
    %cst_134 = arith.constant dense<0.000000e+00> : vector<2x32xf32>
    %216 = tpu.matmul %214, %215, %cst_134 {dimension_numbers = #tpu.dot_dimension_numbers<[1], [0], [0], [1], [0, 0, 1, 1], [], []>} : vector<2x16xf32>, vector<16x32xf32>, vector<2x32xf32> -> vector<2x32xf32>
    %c0_135 = arith.constant 0 : index
    %c0_136 = arith.constant 0 : index
    %217 = vector.load %arg14[%c0_135, %c0_136] : memref<1x32xf32, #tpu.memory_space<vmem>>, vector<1x32xf32>
    %218 = vector.broadcast %217 : vector<1x32xf32> to vector<2x32xf32>
    %219 = arith.addf %216, %218 : vector<2x32xf32>
    %c2_i32_137 = arith.constant 2 : i32
    %220 = arith.muli %c3_i32, %c2_i32_137 : i32
    %221 = tpu.assume_multiple %220, 2 : i32
    %222 = arith.index_cast %221 : i32 to index
    %c0_138 = arith.constant 0 : index
    %223 = vector.load %arg18[%222, %c0_138] : memref<8x32xf32, #tpu.memory_space<vmem>>, vector<2x32xf32>
    tpu.vector_store %arg18[%222, %c0_138], %219 {strides = array<i32>} : memref<8x32xf32, #tpu.memory_space<vmem>>, vector<2x32xf32>,
    %c4_i32 = arith.constant 4 : i32
    %c0_139 = arith.constant 0 : index
    %c0_140 = arith.constant 0 : index
    %224 = vector.load %arg18[%c0_139, %c0_140] : memref<8x32xf32, #tpu.memory_space<vmem>>, vector<8x32xf32>
    %c0_141 = arith.constant 0 : index
    %c0_142 = arith.constant 0 : index
    %225 = vector.load %arg15[%c0_141, %c0_142] : memref<32x64xf32, #tpu.memory_space<vmem>>, vector<32x64xf32>
    %cst_143 = arith.constant dense<0.000000e+00> : vector<8x64xf32>
    %226 = tpu.matmul %224, %225, %cst_143 {dimension_numbers = #tpu.dot_dimension_numbers<[1], [0], [0], [1], [0, 0, 1, 1], [], []>} : vector<8x32xf32>, vector<32x64xf32>, vector<8x64xf32> -> vector<8x64xf32>
    %c0_144 = arith.constant 0 : index
    %c0_145 = arith.constant 0 : index
    %227 = vector.load %arg16[%c0_144, %c0_145] : memref<1x64xf32, #tpu.memory_space<vmem>>, vector<1x64xf32>
    %228 = vector.broadcast %227 : vector<1x64xf32> to vector<8x64xf32>
    %229 = arith.addf %226, %228 : vector<8x64xf32>
    %c0_146 = arith.constant 0 : index
    %c0_147 = arith.constant 0 : index
    %230 = vector.load %arg17[%c0_146, %c0_147] : memref<8x64xf32, #tpu.memory_space<vmem>>, vector<8x64xf32>
    tpu.vector_store %arg17[%c0_146, %c0_147], %229 {strides = array<i32>} : memref<8x64xf32, #tpu.memory_space<vmem>>, vector<8x64xf32>,
    return
  }
  func.func @transform_0(%arg0: i32) -> (i32, i32) {
    %c0_i32 = arith.constant 0 : i32
    %c0_i32_0 = arith.constant 0 : i32
    %c0_i32_1 = arith.constant 0 : i32
    return %c0_i32, %c0_i32_0 : i32, i32
  }
  func.func @transform_1(%arg0: i32) -> (i32, i32, i32) {
    %c0_i32 = arith.constant 0 : i32
    %c0_i32_0 = arith.constant 0 : i32
    %c0_i32_1 = arith.constant 0 : i32
    %c0_i32_2 = arith.constant 0 : i32
    return %c0_i32, %c0_i32_0, %c0_i32_1 : i32, i32, i32
  }
  func.func @transform_2(%arg0: i32) -> (i32, i32) {
    %c0_i32 = arith.constant 0 : i32
    %c0_i32_0 = arith.constant 0 : i32
    %c0_i32_1 = arith.constant 0 : i32
    return %c0_i32, %c0_i32_0 : i32, i32
  }
  func.func @transform_3(%arg0: i32) -> (i32, i32) {
    %c0_i32 = arith.constant 0 : i32
    %c0_i32_0 = arith.constant 0 : i32
    %c0_i32_1 = arith.constant 0 : i32
    return %c0_i32, %c0_i32_0 : i32, i32
  }
  func.func @transform_4(%arg0: i32) -> (i32, i32) {
    %c0_i32 = arith.constant 0 : i32
    %c0_i32_0 = arith.constant 0 : i32
    %c0_i32_1 = arith.constant 0 : i32
    return %c0_i32, %c0_i32_0 : i32, i32
  }
  func.func @transform_5(%arg0: i32) -> (i32, i32) {
    %c0_i32 = arith.constant 0 : i32
    %c0_i32_0 = arith.constant 0 : i32
    %c0_i32_1 = arith.constant 0 : i32
    return %c0_i32, %c0_i32_0 : i32, i32
  }
  func.func @transform_6(%arg0: i32) -> (i32, i32) {
    %c0_i32 = arith.constant 0 : i32
    %c0_i32_0 = arith.constant 0 : i32
    %c0_i32_1 = arith.constant 0 : i32
    return %c0_i32, %c0_i32_0 : i32, i32
  }
  func.func @transform_7(%arg0: i32) -> (i32, i32) {
    %c0_i32 = arith.constant 0 : i32
    %c0_i32_0 = arith.constant 0 : i32
    %c0_i32_1 = arith.constant 0 : i32
    return %c0_i32, %c0_i32_0 : i32, i32
  }
  func.func @transform_8(%arg0: i32) -> (i32, i32) {
    %c0_i32 = arith.constant 0 : i32
    %c0_i32_0 = arith.constant 0 : i32
    %c0_i32_1 = arith.constant 0 : i32
    return %c0_i32, %c0_i32_0 : i32, i32
  }
  func.func @transform_9(%arg0: i32) -> (i32, i32) {
    %c0_i32 = arith.constant 0 : i32
    %c0_i32_0 = arith.constant 0 : i32
    %c0_i32_1 = arith.constant 0 : i32
    return %c0_i32, %c0_i32_0 : i32, i32
  }
  func.func @transform_10(%arg0: i32) -> (i32, i32) {
    %c0_i32 = arith.constant 0 : i32
    %c0_i32_0 = arith.constant 0 : i32
    %c0_i32_1 = arith.constant 0 : i32
    return %c0_i32, %c0_i32_0 : i32, i32
  }
  func.func @transform_11(%arg0: i32) -> (i32, i32) {
    %c0_i32 = arith.constant 0 : i32
    %c0_i32_0 = arith.constant 0 : i32
    %c0_i32_1 = arith.constant 0 : i32
    return %c0_i32, %c0_i32_0 : i32, i32
  }
  func.func @transform_12(%arg0: i32) -> (i32, i32) {
    %c0_i32 = arith.constant 0 : i32
    %c0_i32_0 = arith.constant 0 : i32
    %c0_i32_1 = arith.constant 0 : i32
    return %c0_i32, %c0_i32_0 : i32, i32
  }
  func.func @transform_13(%arg0: i32) -> (i32, i32) {
    %c0_i32 = arith.constant 0 : i32
    %c0_i32_0 = arith.constant 0 : i32
    %c0_i32_1 = arith.constant 0 : i32
    return %c0_i32, %c0_i32_0 : i32, i32
  }
  func.func @transform_14(%arg0: i32) -> (i32, i32) {
    %c0_i32 = arith.constant 0 : i32
    %c0_i32_0 = arith.constant 0 : i32
    %c0_i32_1 = arith.constant 0 : i32
    return %c0_i32, %c0_i32_0 : i32, i32
  }
  func.func @transform_15(%arg0: i32) -> (i32, i32) {
    %c0_i32 = arith.constant 0 : i32
    %c0_i32_0 = arith.constant 0 : i32
    %c0_i32_1 = arith.constant 0 : i32
    return %c0_i32, %c0_i32_0 : i32, i32
  }
  func.func @transform_16(%arg0: i32) -> (i32, i32) {
    %c0_i32 = arith.constant 0 : i32
    %c0_i32_0 = arith.constant 0 : i32
    %c0_i32_1 = arith.constant 0 : i32
    return %c0_i32, %c0_i32_0 : i32, i32
  }
}

</mosaic_0001>

<bundles_post_ra>
// kernel: tpu_custom_call.1
= control target key start
LH: loop header
LB: loop body
LE: loop exit
PB: predicated region body
PF: predicated region fallthrough
CT: control target
= control target key end

     0   :  { %s1997_s0 = inlined_call_operand.vmem [shape: f32[2,32], index: 0, kind: input, shape index: {}]   ;;  %s1998_s1 = inlined_call_operand.vmem [shape: f32[2,8,64], index: 1, kind: input, shape index: {}]   ;;  %s1999_s2 = inlined_call_operand.vmem [shape: f32[32,32], index: 2, kind: input, shape index: {}]   ;;  %s2000_s3 = inlined_call_operand.vmem [shape: f32[64,32], index: 3, kind: input, shape index: {}]   ;;  %s2001_s4 = inlined_call_operand.vmem [shape: f32[1,32], index: 4, kind: input, shape index: {}]   ;;  %s2002_s5 = inlined_call_operand.vmem [shape: f32[1,32], index: 5, kind: input, shape index: {}]   ;;  %s2003_s6 = inlined_call_operand.vmem [shape: f32[32,16], index: 6, kind: input, shape index: {}]   ;;  %s2004_s7 = inlined_call_operand.vmem [shape: f32[1,16], index: 7, kind: input, shape index: {}]   ;;  %s2005_s8 = inlined_call_operand.vmem [shape: f32[16,32], index: 8, kind: input, shape index: {}]   ;;  %s2006_s9 = inlined_call_operand.vmem [shape: f32[1,32], index: 9, kind: input, shape index: {}]   ;;  %s2007_s10 = inlined_call_operand.vmem [shape: f32[128,16], index: 10, kind: input, shape index: {}]   ;;  %s2008_s11 = inlined_call_operand.vmem [shape: f32[1,16], index: 11, kind: input, shape index: {}]   ;;  %s2009_s12 = inlined_call_operand.vmem [shape: f32[16,32], index: 12, kind: input, shape index: {}]   ;;  %s2010_s13 = inlined_call_operand.vmem [shape: f32[1,32], index: 13, kind: input, shape index: {}]   ;;  %s2011_s14 = inlined_call_operand.vmem [shape: f32[32,64], index: 14, kind: input, shape index: {}]   ;;  %s2012_s15 = inlined_call_operand.vmem [shape: f32[1,64], index: 15, kind: input, shape index: {}]   ;;  %s2013_s16 = inlined_call_operand.hbm [shape: f32[8,64], index: 16, kind: output, shape index: {}]  }
   0x1   :  { %2014 = sst [smem:[#allocation6_spill]] %s1997_s0 }
   0x2   :  { %v63_v0 = vld [vmem:[%s2000_s3 + $0x38] sm:$0xff]  ;;  %v62_v2 = vld [vmem:[%s2000_s3 + $0x30] sm:$0xff]  ;;  %v61_v4 = vld [vmem:[%s2000_s3 + $0x28] sm:$0xff]  ;;  %s2015_s28 = sld [smem:[#allocation6_spill]]  ;;  %vm106_vm0 = vcmask 261120   ;;  %vm64_vm1 = vcmask 523264  }
   0x3   :  { %v1489_v1 = vld [vmem:[%s2003_s6 + $0x18] sm:$0xff]  ;;  %79 = vmatpush.msra.mxu0 %v63_v0  ;;  %v1498_v3 = vld [vmem:[%s2003_s6 + $0x10] sm:$0xff]  ;;  %v1506_v5 = vld [vmem:[%s2003_s6 + $0x8] sm:$0xff] }
   0x4   :  { %271 = vmatpush.msra.mxu2 %v1489_v1  ;;  %v1512_v6 = vld [vmem:[%s1999_s2 + $0x18] sm:$0xff]  ;;  %v60_v7 = vld [vmem:[%s2000_s3 + $0x20] sm:$0xff]  ;;  %v1526_v9 = vld [vmem:[%s1999_s2 + $0x10] sm:$0xff] }
   0x5   :  { %80 = vmatpush.msra.mxu0 %v62_v2  ;;  %v1520_v8 = vld [vmem:[%s2003_s6] sm:$0xff]  ;;  %122 = vmatpush.msra.mxu1 %v1512_v6  ;;  %v59_v11 = vld [vmem:[%s2000_s3 + $0x18] sm:$0xff]  ;;  %v1538_v12 = vld [vmem:[%s1999_s2 + $0x8] sm:$0xff] }
   0x6   :  { %272 = vmatpush.msra.mxu2 %v1498_v3  ;;  %v58_v13 = vld [vmem:[%s2000_s3 + $0x10] sm:$0xff]  ;;  %v1547_v14 = vld [vmem:[%s1999_s2] sm:$0xff]  ;;  %v57_v15 = vld [vmem:[%s2000_s3 + $0x8] sm:$0xff] }
   0x7   :  { %81 = vmatpush.msra.mxu0 %v61_v4  ;;  %123 = vmatpush.msra.mxu1 %v1526_v9  ;;  %v56_v16 = vld [vmem:[%s2000_s3] sm:$0xff] }
   0x8   :  { %273 = vmatpush.msra.mxu2 %v1506_v5  ;;  %v101_v10 = vld [vmem:[%s2015_s28] sm:$0x3] }
   0x9   :  { %82 = vmatpush.msra.mxu0 %v60_v7  ;;  %124 = vmatpush.msra.mxu1 %v1538_v12  ;;  %v1565_v17 = vld [vmem:[%s1998_s1] sm:$0xff] }
   0xa   :  { %274 = vmatpush.msra.mxu2 %v1520_v8 }
   0xb   :  { %1292 = vmatmul.msk.f32.vlgmr.msra.gmra.mxu2 %vm106_vm0, %v101_v10  ;;  %83 = vmatpush.msra.mxu0 %v59_v11 }
   0xc   :  { %412 = vmatpush.msrb.mxu2 %v1512_v6  ;;  %125 = vmatpush.msra.mxu1 %v1547_v14 }
   0xd   :  { %84 = vmatpush.msra.mxu0 %v58_v13  ;;  %1291 = vmatmul.msk.f32.vlgmr.msra.gmra.mxu1 %vm106_vm0, %v101_v10 }
   0xe   :  { %413 = vmatpush.msrb.mxu2 %v1526_v9 }
   0xf   :  { %85 = vmatpush.msra.mxu0 %v57_v15 }
  0x10   :  { %21 = vsyncpa [#allocation4], 0  ;;  %414 = vmatpush.msrb.mxu2 %v1538_v12  ;;  %v1574_v18 = vld [vmem:[%s1998_s1 + $0x8] sm:$0xff]  ;;  %v280_v20 = vld [vmem:[%s2005_s8] sm:$0xff]  ;;  %vm286_vm2 = vcmask 130048   ;;  %v153_v44 = vlaneseq  ;;  %vm157_vm3 = vcmask 1041409  }
  0x11   :  { %86 = vmatpush.msra.mxu0 %v56_v16  ;;  %v281_v19 = vld [vmem:[%s2005_s8 + $0x8] sm:$0xff]  ;;  %v1315_v21 = vld [vmem:[%s2004_s7] ss:$0 sm:$0xff]  ;;  %vm160_vm4 = vcmask 58368   ;;  %v1394_v54 = vmov 0   ;;  %s1395_s21 = smov 32  }
  0x12   :  { %1289 = vmatmul.msk.f32.vlgmr.msra.gmra.mxu0 %vm64_vm1, %v1565_v17  ;;  %415 = vmatpush.msrb.mxu2 %v1547_v14  ;;  %v1316_v23 = vld [vmem:[%s2001_s4] ss:$0 sm:$0xff]  ;;  %v1606_v45 = vand.u32 127, %v153_v44  ;;  %s1396_s22 = smov 64   ;;  %vm392_vm13 = vcmask 254976   ;;  %s1397_s4 = smov [#allocation3]  }
  0x13   :  { %304 = vmatpush.msra.mxu3 %v281_v19  ;;  %v1597_v31 = vld [vmem:[%s2002_s5] ss:$0 sm:$0xff]  ;;  %1313 = vset.pattern.permute.xlu2 %v1394_v54  ;;  %s1278_s5 = sshll.u32 %s1397_s4, 4  ;;  %s1279_s5 = int_to_ptr.vmem [resolvable:$true] %s1278_s5 }
  0x14   :  { %586 = vmatpush.msra.mxu2 %v281_v19  ;;  %v1318_v46 = vld [vmem:[%s2006_s9] ss:$0 sm:$0xff]  ;;  %1312 = vset.pattern.permute.xlu1 %v1394_v54 }
  0x15   :  { %305 = vmatpush.msra.mxu3 %v280_v20  ;;  %1314 = vset.pattern.permute.xlu0 %v1394_v54 }
  0x16   :  { %587 = vmatpush.msra.mxu2 %v280_v20 }
  0x1a   :  { %1290 = vmatmul.msk.f32.gmra.mxu0 %vm64_vm1, %v1574_v18 }
  0x8a   :  { %v127_v22 = vpop.f32.mrf.mxu1 }
  0x8b   :  { %v132_v26 = vperm.slane %v127_v22, 0  ;;  %v131_v32 = vrot.slane %v127_v22, 1 }
  0x8d   :  { %v133_v36 = vperm.slane %v131_v32, 0 }
  0x8e   :  { %v276_v24 = vpop.f32.mrf.mxu2 }
  0x8f   :  { %v277_v25 = vadd.f32 %v1315_v21, %v276_v24  ;;  %v88_v27 = vpop.f32.mrf.mxu0 }
  0x90   :  { %v1590_v29 = vadd.f32 %v1316_v23, %v88_v27 }
  0x91   :  { %v279_v28 = vmax.f32 %v277_v25, 0.0 }
  0x92   :  { %v136_v30 = vadd.f32 %v132_v26, %v1590_v29 }
  0x93   :  { %1293 = vmatmul.msk.f32.vlgmr.msra.gmra.mxu3 %vm286_vm2, %v279_v28 }
  0x94   :  { %v138_v33 = vmax.f32 %v136_v30, 0.0 }
  0x96   :  { %v143_v34 = vmul.f32 %v1597_v31, %v138_v33 }
  0x97   :  { %v91_v35 = vpop.f32.mrf.mxu0 }
  0x98   :  { %v1600_v37 = vadd.f32 %v1316_v23, %v91_v35  ;;  %v145_v38 = vsel %vm106_vm0, %v143_v34, 0.0 }
  0x99   :  { %146 = vadd.xlane.f32.xlu0 %v145_v38 }
  0x9a   :  { %v137_v39 = vadd.f32 %v133_v36, %v1600_v37 }
  0x9c   :  { %v139_v40 = vmax.f32 %v137_v39, 0.0 }
  0x9e   :  { %v144_v41 = vmul.f32 %v1597_v31, %v139_v40 }
  0xa0   :  { %v148_v42 = vsel %vm106_vm0, %v144_v41, 0.0 }
  0xa1   :  { %149 = vadd.xlane.f32.xlu0 %v148_v42 }
 0x10c   :  { %v147_v43 = vpop.xlane.xlu0 %146 }
 0x10d   :  { %v155_v48 = vperm.slane %v147_v43, %v1606_v45 }
 0x114   :  { %v150_v47 = vpop.xlane.xlu0 %149 }
 0x115   :  { %v156_v49 = vperm.slane %v150_v47, %v1606_v45 }
 0x116   :  { %v307_v50 = vpop.f32.mrf.mxu3 }
 0x117   :  { %v1613_v51 = vadd.f32 %v1318_v46, %v307_v50  ;;  %v158_v52 = vsel %vm157_vm3, %v156_v49, %v155_v48 }
 0x118   :  { %v161_v53 = vsel %vm160_vm4, %v158_v52, -inf }
 0x119   :  { %1295 = vmatmul.msk.f32.vlgmr.msrb.gmra.mxu2 %vm106_vm0, %v1613_v51  ;;  %162 = vmax.xlane.f32.xlu1 %v161_v53 }
 0x11a   :  { %868 = vmatpush.msrb.mxu2 %v281_v19 }
 0x11c   :  { %869 = vmatpush.msrb.mxu2 %v280_v20 }
 0x18c   :  { %v163_v55 = vpop.xlane.xlu1 %162 }
 0x18d   :  { %v165_v56 = vperm.slane %v163_v55, 0  ;;  %v166_v57 = vperm.slane %v163_v55, 1 }
 0x18f   :  { %v169_v58 = vsub.f32 %v147_v43, %v165_v56  ;;  %v170_v59 = vsub.f32 %v150_v47, %v166_v57 }
 0x191   :  { %v171_v60 = vmul.f32 1.442695, %v169_v58  ;;  %v173_v61 = vmul.f32 1.442695, %v170_v59 }
 0x193   :  { %1334 = vpow2.f32 %v171_v60 }
 0x194   :  { %1336 = vpow2.f32 %v173_v61 }
 0x199   :  { %v1335_v62 = vpop.eup %1334 }
 0x19a   :  { %v1337_v63 = vpop.eup %1336  ;;  %178 = vperm.xlu1 %1312, %v1335_v62  }
 0x19b   :  { %181 = vperm.xlu2 %1313, %v1337_v63  }
 0x19c   :  { %v417_v0 = vpop.f32.mrf.mxu2 }
 0x19d   :  { %v422_v2 = vperm.slane %v417_v0, 0  ;;  %v421_v52 = vrot.slane %v417_v0, 1 }
 0x19f   :  { %v426_v7 = vadd.f32 %v422_v2, %v1590_v29  ;;  %v423_v53 = vperm.slane %v421_v52, 0 }
 0x1a1   :  { %v428_v16 = vmax.f32 %v426_v7, 0.0  ;;  %v427_v54 = vadd.f32 %v423_v53, %v1600_v37 }
 0x1a3   :  { %v430_v20 = vmul.f32 %v1597_v31, %v428_v16  ;;  %v429_v55 = vmax.f32 %v427_v54, 0.0 }
 0x1a5   :  { %v432_v21 = vsel %vm106_vm0, %v430_v20, 0.0  ;;  %v431_v56 = vmul.f32 %v1597_v31, %v429_v55 }
 0x1a7   :  { %v435_v57 = vsel %vm106_vm0, %v431_v56, 0.0 }
 0x1f5   :  { %v182_v4 = vpop.permute.xlu2 %181 }
 0x1f6   :  { %v184_v11 = vperm.slane %v182_v4, %v1606_v45 }
 0x20c   :  { %v179_v10 = vpop.permute.xlu1 %178 }
 0x20d   :  { %v183_v13 = vperm.slane %v179_v10, %v1606_v45 }
 0x20f   :  { %v185_v15 = vsel %vm157_vm3, %v184_v11, %v183_v13 }
 0x210   :  { %v187_v19 = vsel %vm160_vm4, %v185_v15, 0.0 }
 0x211   :  { %188 = vadd.xlane.f32.xlu2 %v187_v19 }
 0x219   :  { %433 = vadd.xlane.f32.xlu2 %v432_v21 }
 0x284   :  { %v189_v22 = vpop.xlane.xlu2 %188 }
 0x285   :  { %v191_v23 = vperm.slane %v189_v22, 0  ;;  %v192_v24 = vperm.slane %v189_v22, 1 }
 0x287   :  { %1338 = vrcp.f32 %v191_v23  ;;  %v206_v33 = vand.u32 2147483648, %v191_v23  ;;  %v221_v34 = vand.u32 2147483648, %v192_v24  ;;  %v204_v36 = vand.u32 2147483647, %v191_v23 }
 0x288   :  { %1340 = vrcp.f32 %v192_v24  ;;  %v219_v39 = vand.u32 2147483647, %v192_v24  ;;  %vm200_vm7 = vweird.f32 %v191_v23  ;;  %vm215_vm8 = vweird.f32 %v192_v24 }
 0x289   :  { %v207_v42 = vor.u32 1.1754944e-38, %v206_v33  ;;  %v222_v43 = vor.u32 1.1754944e-38, %v221_v34  ;;  %vm205_vm11 = vcmp.eq.f32.partialorder %v204_v36, 8.507059e+37  ;;  %v1694_v33 = vld [vmem:[%s2007_s10 + $0x38] sm:$0xff]  ;;  %v1701_v34 = vld [vmem:[%s2007_s10 + $0x30] sm:$0xff]  ;;  %v1715_v36 = vld [vmem:[%s2007_s10 + $0x20] sm:$0xff] }
 0x28a   :  { %vm220_vm12 = vcmp.eq.f32.partialorder %v219_v39, 8.507059e+37  ;;  %v1722_v39 = vld [vmem:[%s2007_s10 + $0x18] sm:$0xff] }
 0x28d   :  { %v1339_v25 = vpop.eup %1338 }
 0x28e   :  { %v1341_v26 = vpop.eup %1340  ;;  %v196_v27 = vmul.f32 %v1339_v25, %v191_v23  ;;  %vm201_vm5 = vweird.f32 %v1339_v25  ;;  %v1640_v23 = vld [vmem:[%s2007_s10 + $0x78] sm:$0xff] }
 0x28f   :  { %v211_v28 = vmul.f32 %v1341_v26, %v192_v24  ;;  %vm216_vm6 = vweird.f32 %v1341_v26  ;;  %vm202_vm9 = vmor %vm200_vm7, %vm201_vm5  ;;  %v1645_v24 = vld [vmem:[%s2007_s10 + $0x70] sm:$0xff]  ;;  %342 = vmatpush.msrb.mxu3 %v1640_v23  ;;  %624 = vmatpush.msrb.mxu0 %v1640_v23 }
 0x290   :  { %v197_v30 = vsub.f32 1.0, %v196_v27  ;;  %vm217_vm10 = vmor %vm215_vm8, %vm216_vm6  ;;  %v1666_v27 = vld [vmem:[%s2007_s10 + $0x58] sm:$0xff] }
 0x291   :  { %v212_v32 = vsub.f32 1.0, %v211_v28  ;;  %343 = vmatpush.msrb.mxu3 %v1645_v24  ;;  %625 = vmatpush.msrb.mxu0 %v1645_v24  ;;  %v1673_v28 = vld [vmem:[%s2007_s10 + $0x50] sm:$0xff] }
 0x292   :  { %v198_v35 = vmul.f32 %v1339_v25, %v197_v30  ;;  %v1680_v30 = vld [vmem:[%s2007_s10 + $0x48] sm:$0xff] }
 0x293   :  { %v213_v38 = vmul.f32 %v1341_v26, %v212_v32  ;;  %v1687_v32 = vld [vmem:[%s2007_s10 + $0x40] sm:$0xff] }
 0x294   :  { %v199_v40 = vadd.f32 %v1339_v25, %v198_v35  ;;  %v1708_v35 = vld [vmem:[%s2007_s10 + $0x28] sm:$0xff] }
 0x295   :  { %v214_v41 = vadd.f32 %v1341_v26, %v213_v38 }
 0x296   :  { %v203_v44 = vsel %vm202_vm9, %v1339_v25, %v199_v40  ;;  %v1652_v25 = vld [vmem:[%s2007_s10 + $0x68] sm:$0xff]  ;;  %v434_v40 = vpop.xlane.xlu2 %433 }
 0x297   :  { %v218_v46 = vsel %vm217_vm10, %v1341_v26, %v214_v41  ;;  %v208_v47 = vsel %vm205_vm11, %v207_v42, %v203_v44  ;;  %v1659_v26 = vld [vmem:[%s2007_s10 + $0x60] sm:$0xff]  ;;  %344 = vmatpush.msrb.mxu3 %v1652_v25  ;;  %626 = vmatpush.msrb.mxu0 %v1652_v25  ;;  %v1730_v42 = vld [vmem:[%s2007_s10 + $0x10] sm:$0xff]  ;;  %v1738_v44 = vld [vmem:[%s2007_s10 + $0x8] sm:$0xff] }
 0x298   :  { %v223_v48 = vsel %vm220_vm12, %v222_v43, %v218_v46  ;;  %v209_v49 = vmul.f32 %v1335_v62, %v208_v47  ;;  %v440_v43 = vperm.slane %v434_v40, %v1606_v45 }
 0x299   :  { %v224_v50 = vmul.f32 %v1337_v63, %v223_v48  ;;  %345 = vmatpush.msrb.mxu3 %v1659_v26  ;;  %627 = vmatpush.msrb.mxu0 %v1659_v26  ;;  %v1749_v48 = vld [vmem:[%s2007_s10] sm:$0xff] }
 0x29a   :  { %227 = vperm.xlu0 %1314, %v209_v49  }
 0x29b   :  { %232 = vperm.xlu1 %1312, %v224_v50   ;;  %346 = vmatpush.msrb.mxu3 %v1666_v27 }
 0x29c   :  { %628 = vmatpush.msrb.mxu0 %v1666_v27 }
 0x29d   :  { %347 = vmatpush.msrb.mxu3 %v1673_v28 }
 0x29e   :  { %629 = vmatpush.msrb.mxu0 %v1673_v28 }
 0x29f   :  { %348 = vmatpush.msrb.mxu3 %v1680_v30 }
 0x2a0   :  { %630 = vmatpush.msrb.mxu0 %v1680_v30 }
 0x2a1   :  { %349 = vmatpush.msrb.mxu3 %v1687_v32 }
 0x2a2   :  { %631 = vmatpush.msrb.mxu0 %v1687_v32 }
 0x2a3   :  { %311 = vrot.lane.b32.xlu1 %v1613_v51, %s1395_s21  ;;  %350 = vmatpush.msrb.mxu3 %v1694_v33 }
 0x2a4   :  { %632 = vmatpush.msrb.mxu0 %v1694_v33 }
 0x2a5   :  { %351 = vmatpush.msrb.mxu3 %v1701_v34 }
 0x2a6   :  { %633 = vmatpush.msrb.mxu0 %v1701_v34 }
 0x2a7   :  { %352 = vmatpush.msrb.mxu3 %v1708_v35 }
 0x2a8   :  { %634 = vmatpush.msrb.mxu0 %v1708_v35 }
 0x2a9   :  { %353 = vmatpush.msrb.mxu3 %v1715_v36 }
 0x2aa   :  { %635 = vmatpush.msrb.mxu0 %v1715_v36 }
 0x2ab   :  { %354 = vmatpush.msrb.mxu3 %v1722_v39 }
 0x2ac   :  { %636 = vmatpush.msrb.mxu0 %v1722_v39 }
 0x2ad   :  { %355 = vmatpush.msrb.mxu3 %v1730_v42 }
 0x2ae   :  { %637 = vmatpush.msrb.mxu0 %v1730_v42 }
 0x2af   :  { %356 = vmatpush.msrb.mxu3 %v1738_v44 }
 0x2b0   :  { %638 = vmatpush.msrb.mxu0 %v1738_v44 }
 0x2b1   :  { %357 = vmatpush.msrb.mxu3 %v1749_v48 }
 0x2b2   :  { %639 = vmatpush.msrb.mxu0 %v1749_v48 }
 0x2b3   :  { %906 = vmatpush.msra.mxu3 %v1640_v23 }
 0x2b4   :  { %694 = vmatpush.msra.mxu0 %v1512_v6 }
 0x2b5   :  { %907 = vmatpush.msra.mxu3 %v1645_v24 }
 0x2b6   :  { %695 = vmatpush.msra.mxu0 %v1526_v9 }
 0x2b7   :  { %908 = vmatpush.msra.mxu3 %v1652_v25 }
 0x2b8   :  { %696 = vmatpush.msra.mxu0 %v1538_v12 }
 0x2b9   :  { %909 = vmatpush.msra.mxu3 %v1659_v26 }
 0x2ba   :  { %697 = vmatpush.msra.mxu0 %v1547_v14 }
 0x2bb   :  { %910 = vmatpush.msra.mxu3 %v1666_v27 }
 0x2bd   :  { %911 = vmatpush.msra.mxu3 %v1673_v28 }
 0x2bf   :  { %912 = vmatpush.msra.mxu3 %v1680_v30 }
 0x2c1   :  { %913 = vmatpush.msra.mxu3 %v1687_v32 }
 0x2c3   :  { %914 = vmatpush.msra.mxu3 %v1694_v33 }
 0x2c4   :  { %436 = vadd.xlane.f32.xlu0 %v435_v57 }
 0x2c5   :  { %915 = vmatpush.msra.mxu3 %v1701_v34 }
 0x2c7   :  { %916 = vmatpush.msra.mxu3 %v1708_v35 }
 0x2c9   :  { %917 = vmatpush.msra.mxu3 %v1715_v36 }
 0x2cb   :  { %918 = vmatpush.msra.mxu3 %v1722_v39 }
 0x2cd   :  { %919 = vmatpush.msra.mxu3 %v1730_v42 }
 0x2cf   :  { %920 = vmatpush.msra.mxu3 %v1738_v44 }
 0x2d1   :  { %921 = vmatpush.msra.mxu3 %v1749_v48 }
 0x30c   :  { %v228_v58 = vpop.permute.xlu0 %227 }
 0x30d   :  { %v233_v59 = vpop.permute.xlu1 %232  ;;  %v235_v60 = vmul.f32 %v228_v58, %v1565_v17 }
 0x30e   :  { %v236_v61 = vmul.f32 %v233_v59, %v1574_v18 }
 0x30f   :  { %v237_v62 = vsel %vm64_vm1, %v235_v60, 0.0 }
 0x310   :  { %v244_v63 = vsel %vm64_vm1, %v236_v61, 0.0  ;;  %v238_v0 = vrot.slane %v237_v62, 4 }
 0x311   :  { %v245_v2 = vrot.slane %v244_v63, 4 }
 0x312   :  { %v239_v4 = vadd.f32 %v238_v0, %v237_v62  ;;  %v1790_v0 = vld [vmem:[%s2009_s12] sm:$0xff] }
 0x313   :  { %v246_v7 = vadd.f32 %v245_v2, %v244_v63  ;;  %v1784_v63 = vld [vmem:[%s2009_s12 + $0x8] sm:$0xff]  ;;  %v1319_v2 = vld [vmem:[%s2008_s11] ss:$0 sm:$0xff]  ;;  %s1280_s12 = sshll.u32 %s2013_s16, 4  ;;  %s1281_s12 = int_to_ptr.hbm [resolvable:$true] %s1280_s12 }
 0x314   :  { %v240_v10 = vrot.slane %v239_v4, 2  ;;  %386 = vmatpush.msrb.mxu1 %v1784_v63 }
 0x315   :  { %v247_v11 = vrot.slane %v246_v7, 2  ;;  %v312_v49 = vpop.permute.xlu1 %311 }
 0x316   :  { %v241_v13 = vadd.f32 %v240_v10, %v239_v4  ;;  %v320_v50 = vsel %vm106_vm0, 0.0, %v312_v49  ;;  %387 = vmatpush.msrb.mxu1 %v1790_v0 }
 0x317   :  { %v248_v15 = vadd.f32 %v247_v11, %v246_v7 }
 0x318   :  { %v242_v16 = vrot.slane %v241_v13, 1  ;;  %554 = vmatpush.msra.mxu1 %v1489_v1 }
 0x319   :  { %v249_v19 = vrot.slane %v248_v15, 1 }
 0x31a   :  { %v243_v20 = vadd.f32 %v242_v16, %v241_v13  ;;  %555 = vmatpush.msra.mxu1 %v1498_v3 }
 0x31b   :  { %v250_v21 = vadd.f32 %v249_v19, %v248_v15 }
 0x31c   :  { %556 = vmatpush.msra.mxu1 %v1506_v5 }
 0x31d   :  { %v316_v22 = vsel %vm157_vm3, %v250_v21, %v243_v20 }
 0x31e   :  { %317 = vrot.lane.b32.xlu1 %v316_v22, %s1396_s22  ;;  %557 = vmatpush.msra.mxu1 %v1520_v8 }
 0x337   :  { %v437_v38 = vpop.xlane.xlu0 %436 }
 0x338   :  { %v441_v41 = vperm.slane %v437_v38, %v1606_v45 }
 0x33a   :  { %v442_v46 = vsel %vm157_vm3, %v441_v41, %v440_v43 }
 0x33b   :  { %v444_v47 = vsel %vm160_vm4, %v442_v46, -inf }
 0x348   :  { %445 = vmax.xlane.f32.xlu1 %v444_v47 }
 0x390   :  { %v318_v52 = vpop.permute.xlu1 %317 }
 0x391   :  { %v321_v53 = vsel %vm64_vm1, %v320_v50, %v318_v52 }
 0x392   :  { %358 = vmatmul.f32.vlgmr.msrb.gmra.mxu3 %v321_v53 }
 0x3bb   :  { %v446_v54 = vpop.xlane.xlu1 %445 }
 0x3bc   :  { %v448_v55 = vperm.slane %v446_v54, 0  ;;  %v449_v56 = vperm.slane %v446_v54, 1 }
 0x3be   :  { %v452_v57 = vsub.f32 %v434_v40, %v448_v55  ;;  %v453_v59 = vsub.f32 %v437_v38, %v449_v56  ;;  %v1321_v38 = vld [vmem:[%s2004_s7] ss:$0 sm:$0xff] }
 0x3c0   :  { %v454_v58 = vmul.f32 1.442695, %v452_v57  ;;  %v456_v60 = vmul.f32 1.442695, %v453_v59 }
 0x3c2   :  { %1342 = vpow2.f32 %v454_v58 }
 0x3c3   :  { %1344 = vpow2.f32 %v456_v60 }
 0x3c8   :  { %v1775_v61 = vpop.eup %1342 }
 0x3c9   :  { %461 = vperm.xlu2 %1313, %v1775_v61   ;;  %v1778_v62 = vpop.eup %1344 }
 0x3d1   :  { %464 = vperm.xlu2 %1313, %v1778_v62  }
 0x415   :  { %v359_v4 = vpop.f32.mrf.mxu3 }
 0x416   :  { %v360_v7 = vadd.f32 %v1319_v2, %v359_v4 }
 0x418   :  { %v362_v10 = vmax.f32 %v360_v7, 0.0 }
 0x41a   :  { %1294 = vmatmul.msk.f32.vlgmr.msrb.gmra.mxu1 %vm286_vm2, %v362_v10 }
 0x41b   :  { %668 = vmatpush.msrb.mxu1 %v1784_v63 }
 0x41d   :  { %669 = vmatpush.msrb.mxu1 %v1790_v0 }
 0x422   :  { %1296 = vmatmul.msk.f32.vlgmr.msra.gmra.mxu1 %vm106_vm0, %v1613_v51  ;;  %v1320_v51 = vld [vmem:[%s2010_s13] ss:$0 sm:$0xff] }
 0x423   :  { %v462_v11 = vpop.permute.xlu2 %461  ;;  %836 = vmatpush.msra.mxu1 %v1489_v1 }
 0x424   :  { %v466_v15 = vperm.slane %v462_v11, %v1606_v45 }
 0x425   :  { %837 = vmatpush.msra.mxu1 %v1498_v3 }
 0x427   :  { %838 = vmatpush.msra.mxu1 %v1506_v5 }
 0x429   :  { %839 = vmatpush.msra.mxu1 %v1520_v8 }
 0x42b   :  { %v465_v13 = vpop.permute.xlu2 %464 }
 0x42c   :  { %v467_v16 = vperm.slane %v465_v13, %v1606_v45 }
 0x42e   :  { %v468_v19 = vsel %vm157_vm3, %v467_v16, %v466_v15 }
 0x42f   :  { %v470_v20 = vsel %vm160_vm4, %v468_v19, 0.0  ;;  %v1322_v19 = vld [vmem:[%s2006_s9] ss:$0 sm:$0xff] }
 0x430   :  { %471 = vadd.xlane.f32.xlu2 %v470_v20 }
 0x497   :  { %v389_v21 = vpop.f32.mrf.mxu1 }
 0x498   :  { %v1816_v22 = vadd.f32 %v1320_v51, %v389_v21 }
 0x49a   :  { %393 = vst.msk [vmem:[#allocation2] sm:$0x3] %vm392_vm13, %v1816_v22 }
 0x49f   :  { %v559_v40 = vpop.f32.mrf.mxu1 }
 0x4a0   :  { %v560_v41 = vadd.f32 %v1321_v38, %v559_v40 }
 0x4a2   :  { %v562_v43 = vmax.f32 %v560_v41, 0.0 }
 0x4a3   :  { %v472_v46 = vpop.xlane.xlu2 %471 }
 0x4a4   :  { %v474_v47 = vperm.slane %v472_v46, 0  ;;  %v475_v49 = vperm.slane %v472_v46, 1  ;;  %1297 = vmatmul.msk.f32.vlgmr.msra.gmra.mxu2 %vm286_vm2, %v562_v43 }
 0x4a5   :  { %976 = vmatpush.msra.mxu2 %v1512_v6 }
 0x4a6   :  { %1346 = vrcp.f32 %v474_v47  ;;  %v489_v57 = vand.u32 2147483648, %v474_v47  ;;  %v504_v58 = vand.u32 2147483648, %v475_v49  ;;  %v487_v60 = vand.u32 2147483647, %v474_v47 }
 0x4a7   :  { %1348 = vrcp.f32 %v475_v49  ;;  %977 = vmatpush.msra.mxu2 %v1526_v9  ;;  %v502_v2 = vand.u32 2147483647, %v475_v49  ;;  %vm483_vm5 = vweird.f32 %v474_v47  ;;  %vm498_vm6 = vweird.f32 %v475_v49 }
 0x4a8   :  { %vm488_vm9 = vcmp.eq.f32.partialorder %v487_v60, 8.507059e+37 }
 0x4a9   :  { %978 = vmatpush.msra.mxu2 %v1538_v12  ;;  %v490_v12 = vor.u32 1.1754944e-38, %v489_v57  ;;  %vm503_vm10 = vcmp.eq.f32.partialorder %v502_v2, 8.507059e+37 }
 0x4ab   :  { %979 = vmatpush.msra.mxu2 %v1547_v14  ;;  %v505_v14 = vor.u32 1.1754944e-38, %v504_v58 }
 0x4ac   :  { %v1347_v50 = vpop.eup %1346 }
 0x4ad   :  { %v1349_v52 = vpop.eup %1348  ;;  %v479_v53 = vmul.f32 %v1347_v50, %v474_v47  ;;  %vm484_vm14 = vweird.f32 %v1347_v50 }
 0x4ae   :  { %v494_v54 = vmul.f32 %v1349_v52, %v475_v49  ;;  %vm499_vm15 = vweird.f32 %v1349_v52  ;;  %vm485_vm7 = vmor %vm483_vm5, %vm484_vm14 }
 0x4af   :  { %v480_v55 = vsub.f32 1.0, %v479_v53  ;;  %vm500_vm8 = vmor %vm498_vm6, %vm499_vm15 }
 0x4b0   :  { %v495_v56 = vsub.f32 1.0, %v494_v54 }
 0x4b1   :  { %v481_v59 = vmul.f32 %v1347_v50, %v480_v55 }
 0x4b2   :  { %v496_v6 = vmul.f32 %v1349_v52, %v495_v56 }
 0x4b3   :  { %v482_v4 = vadd.f32 %v1347_v50, %v481_v59 }
 0x4b4   :  { %v497_v9 = vadd.f32 %v1349_v52, %v496_v6 }
 0x4b5   :  { %v486_v7 = vsel %vm485_vm7, %v1347_v50, %v482_v4 }
 0x4b6   :  { %v501_v10 = vsel %vm500_vm8, %v1349_v52, %v497_v9  ;;  %v491_v11 = vsel %vm488_vm9, %v490_v12, %v486_v7 }
 0x4b7   :  { %v506_v13 = vsel %vm503_vm10, %v505_v14, %v501_v10  ;;  %v492_v15 = vmul.f32 %v1775_v61, %v491_v11 }
 0x4b8   :  { %v507_v16 = vmul.f32 %v1778_v62, %v506_v13 }
 0x4b9   :  { %510 = vperm.xlu0 %1314, %v492_v15  }
 0x4ba   :  { %515 = vperm.xlu1 %1312, %v507_v16  }
 0x527   :  { %v589_v20 = vpop.f32.mrf.mxu2 }
 0x528   :  { %v590_v51 = vadd.f32 %v1322_v19, %v589_v20  ;;  %v1324_v19 = vld [vmem:[%s2010_s13] ss:$0 sm:$0xff] }
 0x52a   :  { %593 = vrot.lane.b32.xlu0 %v590_v51, %s1395_s21 }
 0x52b   :  { %v511_v21 = vpop.permute.xlu0 %510 }
 0x52c   :  { %v516_v38 = vpop.permute.xlu1 %515  ;;  %v518_v40 = vmul.f32 %v511_v21, %v1565_v17 }
 0x52d   :  { %v519_v41 = vmul.f32 %v516_v38, %v1574_v18 }
 0x52e   :  { %v520_v61 = vsel %vm64_vm1, %v518_v40, 0.0  ;;  %v1325_v40 = vld [vmem:[%s2004_s7] ss:$0 sm:$0xff] }
 0x52f   :  { %v527_v62 = vsel %vm64_vm1, %v519_v41, 0.0  ;;  %v521_v43 = vrot.slane %v520_v61, 4 }
 0x530   :  { %v528_v46 = vrot.slane %v527_v62, 4 }
 0x531   :  { %v522_v47 = vadd.f32 %v521_v43, %v520_v61 }
 0x532   :  { %v529_v49 = vadd.f32 %v528_v46, %v527_v62 }
 0x533   :  { %v523_v50 = vrot.slane %v522_v47, 2 }
 0x534   :  { %v530_v52 = vrot.slane %v529_v49, 2 }
 0x535   :  { %v524_v53 = vadd.f32 %v523_v50, %v522_v47 }
 0x536   :  { %v531_v54 = vadd.f32 %v530_v52, %v529_v49 }
 0x537   :  { %v525_v55 = vrot.slane %v524_v53, 1 }
 0x538   :  { %v532_v56 = vrot.slane %v531_v54, 1 }
 0x539   :  { %v526_v57 = vadd.f32 %v525_v55, %v524_v53 }
 0x53a   :  { %v533_v58 = vadd.f32 %v532_v56, %v531_v54 }
 0x53c   :  { %v598_v59 = vsel %vm157_vm3, %v533_v58, %v526_v57 }
 0x53d   :  { %599 = vrot.lane.b32.xlu1 %v598_v59, %s1396_s22 }
 0x59c   :  { %v594_v60 = vpop.permute.xlu0 %593 }
 0x59d   :  { %v602_v6 = vsel %vm106_vm0, %v1816_v22, %v594_v60  ;;  %v1323_v22 = vld [vmem:[%s2008_s11] ss:$0 sm:$0xff] }
 0x5af   :  { %v600_v2 = vpop.permute.xlu1 %599 }
 0x5b0   :  { %v603_v4 = vsel %vm64_vm1, %v602_v6, %v600_v2 }
 0x5b1   :  { %640 = vmatmul.f32.vlgmr.msrb.gmra.mxu0 %v603_v4 }
 0x5b2   :  { %1118 = vmatpush.msrb.mxu0 %v1489_v1 }
 0x5b4   :  { %1119 = vmatpush.msrb.mxu0 %v1498_v3 }
 0x5b6   :  { %1120 = vmatpush.msrb.mxu0 %v1506_v5 }
 0x5b8   :  { %1121 = vmatpush.msrb.mxu0 %v1520_v8 }
 0x5b9   :  { %1299 = vmatmul.msk.f32.vlgmr.msra.gmra.mxu0 %vm106_vm0, %v590_v51 }
 0x5ba   :  { %1232 = vmatpush.msra.mxu0 %v1784_v63 }
 0x5bc   :  { %1233 = vmatpush.msra.mxu0 %v1790_v0 }
 0x62e   :  { %v641_v9 = vpop.f32.mrf.mxu0 }
 0x62f   :  { %v642_v12 = vadd.f32 %v1323_v22, %v641_v9 }
 0x631   :  { %v644_v14 = vmax.f32 %v642_v12, 0.0 }
 0x633   :  { %1298 = vmatmul.msk.f32.vlgmr.msrb.gmra.mxu1 %vm286_vm2, %v644_v14 }
 0x634   :  { %950 = vmatpush.msrb.mxu1 %v1784_v63 }
 0x636   :  { %v699_v1 = vpop.f32.mrf.mxu0  ;;  %951 = vmatpush.msrb.mxu1 %v1790_v0 }
 0x637   :  { %v703_v3 = vrot.slane %v699_v1, 1  ;;  %v704_v5 = vperm.slane %v699_v1, 0 }
 0x639   :  { %v705_v8 = vperm.slane %v703_v3, 0  ;;  %v708_v7 = vadd.f32 %v704_v5, %v1590_v29 }
 0x63b   :  { %v709_v10 = vadd.f32 %v705_v8, %v1600_v37  ;;  %v710_v11 = vmax.f32 %v708_v7, 0.0  ;;  %1300 = vmatmul.msk.f32.vlgmr.msra.gmra.mxu1 %vm106_vm0, %v590_v51 }
 0x63d   :  { %v712_v13 = vmul.f32 %v1597_v31, %v710_v11  ;;  %v711_v15 = vmax.f32 %v709_v10, 0.0 }
 0x63f   :  { %v714_v16 = vsel %vm106_vm0, %v712_v13, 0.0  ;;  %v713_v63 = vmul.f32 %v1597_v31, %v711_v15 }
 0x640   :  { %715 = vadd.xlane.f32.xlu0 %v714_v16 }
 0x641   :  { %v717_v0 = vsel %vm106_vm0, %v713_v63, 0.0 }
 0x642   :  { %718 = vadd.xlane.f32.xlu2 %v717_v0 }
 0x6b0   :  { %v671_v20 = vpop.f32.mrf.mxu1 }
 0x6b1   :  { %v1866_v21 = vadd.f32 %v1324_v19, %v671_v20 }
 0x6b3   :  { %675 = vst.msk [vmem:[#allocation2 + $0x2] sm:$0x3] %vm392_vm13, %v1866_v21  ;;  %v716_v51 = vpop.xlane.xlu0 %715 }
 0x6b4   :  { %v722_v41 = vperm.slane %v716_v51, %v1606_v45 }
 0x6b5   :  { %v719_v38 = vpop.xlane.xlu2 %718 }
 0x6b6   :  { %v723_v61 = vperm.slane %v719_v38, %v1606_v45 }
 0x6b8   :  { %v841_v62 = vpop.f32.mrf.mxu1  ;;  %v724_v43 = vsel %vm157_vm3, %v723_v61, %v722_v41 }
 0x6b9   :  { %v842_v46 = vadd.f32 %v1325_v40, %v841_v62  ;;  %v726_v47 = vsel %vm160_vm4, %v724_v43, -inf }
 0x6ba   :  { %727 = vmax.xlane.f32.xlu1 %v726_v47 }
 0x6bb   :  { %v844_v49 = vmax.f32 %v842_v46, 0.0 }
 0x6bd   :  { %1301 = vmatmul.msk.f32.vlgmr.msrb.gmra.mxu2 %vm286_vm2, %v844_v49 }
 0x6be   :  { %1188 = vmatpush.msrb.mxu2 %v1640_v23 }
 0x6c0   :  { %1189 = vmatpush.msrb.mxu2 %v1645_v24 }
 0x6c2   :  { %1190 = vmatpush.msrb.mxu2 %v1652_v25 }
 0x6c4   :  { %1191 = vmatpush.msrb.mxu2 %v1659_v26 }
 0x6c6   :  { %1192 = vmatpush.msrb.mxu2 %v1666_v27 }
 0x6c8   :  { %1193 = vmatpush.msrb.mxu2 %v1673_v28 }
 0x6ca   :  { %1194 = vmatpush.msrb.mxu2 %v1680_v30 }
 0x6cc   :  { %1195 = vmatpush.msrb.mxu2 %v1687_v32 }
 0x6ce   :  { %1196 = vmatpush.msrb.mxu2 %v1694_v33  ;;  %v1326_v33 = vld [vmem:[%s2006_s9] ss:$0 sm:$0xff] }
 0x6d0   :  { %1197 = vmatpush.msrb.mxu2 %v1701_v34 }
 0x6d2   :  { %1198 = vmatpush.msrb.mxu2 %v1708_v35 }
 0x6d4   :  { %1199 = vmatpush.msrb.mxu2 %v1715_v36 }
 0x6d6   :  { %1200 = vmatpush.msrb.mxu2 %v1722_v39 }
 0x6d8   :  { %1201 = vmatpush.msrb.mxu2 %v1730_v42 }
 0x6da   :  { %1202 = vmatpush.msrb.mxu2 %v1738_v44 }
 0x6dc   :  { %1203 = vmatpush.msrb.mxu2 %v1749_v48 }
 0x72d   :  { %v728_v23 = vpop.xlane.xlu1 %727 }
 0x72e   :  { %v730_v24 = vperm.slane %v728_v23, 0  ;;  %v731_v25 = vperm.slane %v728_v23, 1 }
 0x730   :  { %v734_v26 = vsub.f32 %v716_v51, %v730_v24  ;;  %v735_v28 = vsub.f32 %v719_v38, %v731_v25 }
 0x732   :  { %v736_v27 = vmul.f32 1.442695, %v734_v26  ;;  %v738_v30 = vmul.f32 1.442695, %v735_v28 }
 0x734   :  { %1350 = vpow2.f32 %v736_v27 }
 0x735   :  { %1352 = vpow2.f32 %v738_v30 }
 0x73a   :  { %v1351_v32 = vpop.eup %1350 }
 0x73b   :  { %743 = vperm.xlu2 %1313, %v1351_v32   ;;  %v1353_v36 = vpop.eup %1352 }
 0x740   :  { %v871_v34 = vpop.f32.mrf.mxu2 }
 0x741   :  { %v872_v35 = vadd.f32 %v1326_v33, %v871_v34 }
 0x743   :  { %746 = vperm.xlu2 %1313, %v1353_v36   ;;  %1303 = vmatmul.msk.f32.vlgmr.msra.gmra.mxu2 %vm106_vm0, %v872_v35 }
 0x744   :  { %1304 = vmatmul.msk.f32.vlgmr.msrb.gmra.mxu0 %vm106_vm0, %v872_v35 }
 0x795   :  { %v744_v39 = vpop.permute.xlu2 %743 }
 0x796   :  { %v748_v44 = vperm.slane %v744_v39, %v1606_v45 }
 0x79d   :  { %v747_v42 = vpop.permute.xlu2 %746 }
 0x79e   :  { %v749_v48 = vperm.slane %v747_v42, %v1606_v45 }
 0x7a0   :  { %v750_v50 = vsel %vm157_vm3, %v749_v48, %v748_v44 }
 0x7a1   :  { %v752_v52 = vsel %vm160_vm4, %v750_v50, 0.0 }
 0x7a2   :  { %753 = vadd.xlane.f32.xlu0 %v752_v52 }
 0x7b6   :  { %875 = vrot.lane.b32.xlu0 %v872_v35, %s1395_s21 }
 0x7c6   :  { %v1904_v53 = vpop.f32.mrf.mxu2 }
 0x7c7   :  { %v985_v54 = vrot.slane %v1904_v53, 1  ;;  %v986_v35 = vperm.slane %v1904_v53, 0 }
 0x7c9   :  { %v987_v55 = vperm.slane %v985_v54, 0 }
 0x7cb   :  { %v991_v56 = vadd.f32 %v987_v55, %v1600_v37 }
 0x7cd   :  { %v993_v57 = vmax.f32 %v991_v56, 0.0 }
 0x7cf   :  { %v995_v58 = vmul.f32 %v1597_v31, %v993_v57  ;;  %v1128_v57 = vld [vmem:[%s2005_s8 + $0x8] sm:$0xff] }
 0x7d0   :  { %1150 = vmatpush.msra.mxu1 %v1128_v57 }
 0x7d1   :  { %v999_v59 = vsel %vm106_vm0, %v995_v58, 0.0  ;;  %v1328_v58 = vld [vmem:[%s2008_s11] ss:$0 sm:$0xff] }
 0x7e0   :  { %1000 = vadd.xlane.f32.xlu0 %v999_v59 }
 0x815   :  { %v754_v60 = vpop.xlane.xlu0 %753 }
 0x816   :  { %v756_v6 = vperm.slane %v754_v60, 0  ;;  %v757_v2 = vperm.slane %v754_v60, 1 }
 0x818   :  { %1354 = vrcp.f32 %v756_v6  ;;  %v771_v3 = vand.u32 2147483648, %v756_v6  ;;  %v786_v5 = vand.u32 2147483648, %v757_v2  ;;  %v769_v8 = vand.u32 2147483647, %v756_v6 }
 0x819   :  { %1356 = vrcp.f32 %v757_v2  ;;  %v784_v10 = vand.u32 2147483647, %v757_v2  ;;  %vm765_vm14 = vweird.f32 %v756_v6  ;;  %vm780_vm15 = vweird.f32 %v757_v2 }
 0x81a   :  { %v772_v15 = vor.u32 1.1754944e-38, %v771_v3  ;;  %v787_v16 = vor.u32 1.1754944e-38, %v786_v5  ;;  %vm770_vm7 = vcmp.eq.f32.partialorder %v769_v8, 8.507059e+37 }
 0x81b   :  { %vm785_vm8 = vcmp.eq.f32.partialorder %v784_v10, 8.507059e+37 }
 0x81e   :  { %v1355_v4 = vpop.eup %1354 }
 0x81f   :  { %v1357_v22 = vpop.eup %1356  ;;  %v761_v9 = vmul.f32 %v1355_v4, %v756_v6  ;;  %vm766_vm11 = vweird.f32 %v1355_v4  ;;  %v1327_v6 = vld [vmem:[%s2004_s7] ss:$0 sm:$0xff] }
 0x820   :  { %v776_v12 = vmul.f32 %v1357_v22, %v757_v2  ;;  %vm781_vm12 = vweird.f32 %v1357_v22  ;;  %vm767_vm5 = vmor %vm765_vm14, %vm766_vm11 }
 0x821   :  { %v762_v14 = vsub.f32 1.0, %v761_v9  ;;  %vm782_vm6 = vmor %vm780_vm15, %vm781_vm12 }
 0x822   :  { %v777_v1 = vsub.f32 1.0, %v776_v12 }
 0x823   :  { %v763_v37 = vmul.f32 %v1355_v4, %v762_v14 }
 0x824   :  { %v778_v7 = vmul.f32 %v1357_v22, %v777_v1 }
 0x825   :  { %v764_v11 = vadd.f32 %v1355_v4, %v763_v37 }
 0x826   :  { %v779_v13 = vadd.f32 %v1357_v22, %v778_v7 }
 0x827   :  { %v768_v63 = vsel %vm767_vm5, %v1355_v4, %v764_v11  ;;  %v1123_v4 = vpop.f32.mrf.mxu0  ;;  %v1329_v11 = vld [vmem:[%s2010_s13] ss:$0 sm:$0xff] }
 0x828   :  { %v783_v0 = vsel %vm782_vm6, %v1357_v22, %v779_v13  ;;  %v773_v19 = vsel %vm770_vm7, %v772_v15, %v768_v63  ;;  %v876_v44 = vpop.permute.xlu0 %875  ;;  %v1124_v22 = vadd.f32 %v1327_v6, %v1123_v4 }
 0x829   :  { %v788_v20 = vsel %vm785_vm8, %v787_v16, %v783_v0  ;;  %v774_v51 = vmul.f32 %v1351_v32, %v773_v19  ;;  %v884_v48 = vsel %vm106_vm0, %v1866_v21, %v876_v44  ;;  %v1127_v21 = vld [vmem:[%s2005_s8] sm:$0xff] }
 0x82a   :  { %v789_v38 = vmul.f32 %v1353_v36, %v788_v20  ;;  %1151 = vmatpush.msra.mxu1 %v1127_v21  ;;  %v1126_v9 = vmax.f32 %v1124_v22, 0.0  ;;  %v1330_v16 = vld [vmem:[%s2006_s9] ss:$0 sm:$0xff] }
 0x82b   :  { %792 = vperm.xlu2 %1313, %v774_v51  }
 0x82c   :  { %797 = vperm.xlu1 %1312, %v789_v38  }
 0x853   :  { %v1001_v54 = vpop.xlane.xlu0 %1000 }
 0x854   :  { %v1005_v53 = vperm.slane %v1001_v54, %v1606_v45 }
 0x885   :  { %v793_v40 = vpop.permute.xlu2 %792 }
 0x886   :  { %v800_v41 = vmul.f32 %v793_v40, %v1565_v17 }
 0x888   :  { %v802_v61 = vsel %vm64_vm1, %v800_v41, 0.0 }
 0x889   :  { %v803_v62 = vrot.slane %v802_v61, 4 }
 0x88b   :  { %v804_v43 = vadd.f32 %v803_v62, %v802_v61 }
 0x88d   :  { %v805_v49 = vrot.slane %v804_v43, 2 }
 0x88f   :  { %v806_v25 = vadd.f32 %v805_v49, %v804_v43 }
 0x891   :  { %v807_v28 = vrot.slane %v806_v25, 1 }
 0x893   :  { %v808_v33 = vadd.f32 %v807_v28, %v806_v25 }
 0x89e   :  { %v798_v46 = vpop.permute.xlu1 %797 }
 0x89f   :  { %v801_v47 = vmul.f32 %v798_v46, %v1574_v18  ;;  %v990_v18 = vadd.f32 %v986_v35, %v1590_v29 }
 0x8a1   :  { %v809_v23 = vsel %vm64_vm1, %v801_v47, 0.0  ;;  %v992_v36 = vmax.f32 %v990_v18, 0.0 }
 0x8a2   :  { %v810_v24 = vrot.slane %v809_v23, 4 }
 0x8a3   :  { %v994_v39 = vmul.f32 %v1597_v31, %v992_v36 }
 0x8a4   :  { %v811_v26 = vadd.f32 %v810_v24, %v809_v23 }
 0x8a5   :  { %v996_v42 = vsel %vm106_vm0, %v994_v39, 0.0 }
 0x8a6   :  { %v812_v27 = vrot.slane %v811_v26, 2 }
 0x8a8   :  { %v813_v30 = vadd.f32 %v812_v27, %v811_v26 }
 0x8aa   :  { %v814_v32 = vrot.slane %v813_v30, 1 }
 0x8ac   :  { %v815_v34 = vadd.f32 %v814_v32, %v813_v30 }
 0x8ae   :  { %v880_v17 = vsel %vm157_vm3, %v815_v34, %v808_v33 }
 0x8af   :  { %881 = vrot.lane.b32.xlu2 %v880_v17, %s1396_s22 }
 0x8d8   :  { %997 = vadd.xlane.f32.xlu2 %v996_v42 }
 0x909   :  { %v882_v50 = vpop.permute.xlu2 %881 }
 0x90a   :  { %v885_v52 = vsel %vm64_vm1, %v884_v48, %v882_v50 }
 0x90b   :  { %922 = vmatmul.f32.vlgmr.msra.gmra.mxu3 %v885_v52  ;;  %v1366_v52 = vld [vmem:[%s1998_s1 + $0x8] sm:$0xff] }
 0x94b   :  { %v998_v55 = vpop.xlane.xlu2 %997 }
 0x94c   :  { %v1004_v29 = vperm.slane %v998_v55, %v1606_v45 }
 0x94e   :  { %v1006_v56 = vsel %vm157_vm3, %v1005_v53, %v1004_v29 }
 0x94f   :  { %v1008_v31 = vsel %vm160_vm4, %v1006_v56, -inf }
 0x950   :  { %1009 = vmax.xlane.f32.xlu1 %v1008_v31  ;;  %v1367_v31 = vld [vmem:[%s1998_s1] sm:$0xff] }
 0x98e   :  { %v923_v59 = vpop.f32.mrf.mxu3 }
 0x98f   :  { %v924_v60 = vadd.f32 %v1328_v58, %v923_v59 }
 0x991   :  { %v926_v2 = vmax.f32 %v924_v60, 0.0 }
 0x993   :  { %1302 = vmatmul.msk.f32.vlgmr.msrb.gmra.mxu1 %vm286_vm2, %v926_v2 }
 0x99b   :  { %1305 = vmatmul.msk.f32.vlgmr.msra.gmra.mxu1 %vm286_vm2, %v1126_v9 }
 0x9c3   :  { %v1010_v12 = vpop.xlane.xlu1 %1009 }
 0x9c4   :  { %v1012_v14 = vperm.slane %v1010_v12, 0  ;;  %v1013_v1 = vperm.slane %v1010_v12, 1 }
 0x9c6   :  { %v1016_v3 = vsub.f32 %v998_v55, %v1012_v14  ;;  %v1017_v5 = vsub.f32 %v1001_v54, %v1013_v1 }
 0x9c8   :  { %v1018_v37 = vmul.f32 1.442695, %v1016_v3  ;;  %v1020_v8 = vmul.f32 1.442695, %v1017_v5 }
 0x9ca   :  { %1358 = vpow2.f32 %v1018_v37 }
 0x9cb   :  { %1360 = vpow2.f32 %v1020_v8 }
 0x9d0   :  { %v1359_v7 = vpop.eup %1358 }
 0x9d1   :  { %v1361_v10 = vpop.eup %1360  ;;  %1025 = vperm.xlu2 %1313, %v1359_v7  }
 0x9d2   :  { %1028 = vperm.xlu0 %1314, %v1361_v10  }
 0xa10   :  { %v953_v13 = vpop.f32.mrf.mxu1 }
 0xa11   :  { %v1944_v15 = vadd.f32 %v1329_v11, %v953_v13 }
 0xa13   :  { %957 = vst.msk [vmem:[#allocation2 + $0x4] sm:$0x3] %vm392_vm13, %v1944_v15 }
 0xa18   :  { %v1153_v63 = vpop.f32.mrf.mxu1 }
 0xa19   :  { %v1154_v0 = vadd.f32 %v1330_v16, %v1153_v63  ;;  %v1244_v16 = vld [vmem:[%s2011_s14 + $0x18] sm:$0xff]  ;;  %v1242_v63 = vld [vmem:[%s2011_s14 + $0x8] sm:$0xff] }
 0xa1a   :  { %1264 = vmatpush.msrb.mxu1 %v1244_v16 }
 0xa1b   :  { %1157 = vrot.lane.b32.xlu0 %v1154_v0, %s1395_s21  ;;  %v1241_v0 = vld [vmem:[%s2011_s14] sm:$0xff] }
 0xa2b   :  { %v1026_v19 = vpop.permute.xlu2 %1025 }
 0xa2c   :  { %v1030_v51 = vperm.slane %v1026_v19, %v1606_v45  ;;  %v1332_v19 = vld [vmem:[%s2010_s13] ss:$0 sm:$0xff] }
 0xa44   :  { %v1029_v20 = vpop.permute.xlu0 %1028 }
 0xa45   :  { %v1031_v38 = vperm.slane %v1029_v20, %v1606_v45 }
 0xa47   :  { %v1032_v40 = vsel %vm157_vm3, %v1031_v38, %v1030_v51 }
 0xa48   :  { %v1034_v41 = vsel %vm160_vm4, %v1032_v40, 0.0  ;;  %v1333_v40 = vld [vmem:[%s2012_s15] ss:$0 sm:$0xff] }
 0xa49   :  { %1035 = vadd.xlane.f32.xlu1 %v1034_v41 }
 0xa8d   :  { %v1158_v3 = vpop.permute.xlu0 %1157 }
 0xa8e   :  { %v1166_v5 = vsel %vm106_vm0, %v1944_v15, %v1158_v3  ;;  %v1243_v15 = vld [vmem:[%s2011_s14 + $0x10] sm:$0xff] }
 0xa8f   :  { %1265 = vmatpush.msrb.mxu1 %v1243_v15 }
 0xa91   :  { %1266 = vmatpush.msrb.mxu1 %v1242_v63 }
 0xa93   :  { %1267 = vmatpush.msrb.mxu1 %v1241_v0 }
 0xabc   :  { %v1036_v61 = vpop.xlane.xlu1 %1035 }
 0xabd   :  { %v1038_v62 = vperm.slane %v1036_v61, 0  ;;  %v1039_v43 = vperm.slane %v1036_v61, 1 }
 0xabf   :  { %1362 = vrcp.f32 %v1038_v62  ;;  %v1053_v26 = vand.u32 2147483648, %v1038_v62  ;;  %v1068_v27 = vand.u32 2147483648, %v1039_v43  ;;  %v1051_v45 = vand.u32 2147483647, %v1038_v62 }
 0xac0   :  { %1364 = vrcp.f32 %v1039_v43  ;;  %v1066_v32 = vand.u32 2147483647, %v1039_v43  ;;  %vm1047_vm4 = vweird.f32 %v1038_v62  ;;  %vm1062_vm11 = vweird.f32 %v1039_v43 }
 0xac1   :  { %v1054_v17 = vor.u32 1.1754944e-38, %v1053_v26  ;;  %v1069_v35 = vor.u32 1.1754944e-38, %v1068_v27  ;;  %vm1052_vm15 = vcmp.eq.f32.partialorder %v1051_v45, 8.507059e+37 }
 0xac2   :  { %vm1067_vm5 = vcmp.eq.f32.partialorder %v1066_v32, 8.507059e+37 }
 0xac5   :  { %v1363_v46 = vpop.eup %1362 }
 0xac6   :  { %v1365_v47 = vpop.eup %1364  ;;  %v1043_v49 = vmul.f32 %v1363_v46, %v1038_v62  ;;  %vm1048_vm9 = vweird.f32 %v1363_v46 }
 0xac7   :  { %v1058_v23 = vmul.f32 %v1365_v47, %v1039_v43  ;;  %vm1063_vm10 = vweird.f32 %v1365_v47  ;;  %vm1049_vm12 = vmor %vm1047_vm4, %vm1048_vm9 }
 0xac8   :  { %v1044_v24 = vsub.f32 1.0, %v1043_v49  ;;  %vm1064_vm14 = vmor %vm1062_vm11, %vm1063_vm10 }
 0xac9   :  { %v1059_v25 = vsub.f32 1.0, %v1058_v23 }
 0xaca   :  { %v1045_v28 = vmul.f32 %v1363_v46, %v1044_v24 }
 0xacb   :  { %v1060_v30 = vmul.f32 %v1365_v47, %v1059_v25 }
 0xacc   :  { %v1046_v33 = vadd.f32 %v1363_v46, %v1045_v28 }
 0xacd   :  { %v1061_v34 = vadd.f32 %v1365_v47, %v1060_v30 }
 0xace   :  { %v1050_v18 = vsel %vm1049_vm12, %v1363_v46, %v1046_v33 }
 0xacf   :  { %v1065_v36 = vsel %vm1064_vm14, %v1365_v47, %v1061_v34  ;;  %v1055_v39 = vsel %vm1052_vm15, %v1054_v17, %v1050_v18 }
 0xad0   :  { %v1070_v42 = vsel %vm1067_vm5, %v1069_v35, %v1065_v36  ;;  %v1056_v44 = vmul.f32 %v1359_v7, %v1055_v39  ;;  %v1331_v7 = vld [vmem:[%s2008_s11] ss:$0 sm:$0xff] }
 0xad1   :  { %v1071_v48 = vmul.f32 %v1361_v10, %v1070_v42 }
 0xad2   :  { %1074 = vperm.xlu1 %1312, %v1056_v44  }
 0xad3   :  { %1079 = vperm.xlu2 %1313, %v1071_v48  }
 0xb2d   :  { %v1080_v50 = vpop.permute.xlu2 %1079 }
 0xb2e   :  { %v1083_v54 = vmul.f32 %v1366_v52, %v1080_v50 }
 0xb30   :  { %v1091_v55 = vsel %vm64_vm1, %v1083_v54, 0.0 }
 0xb31   :  { %v1092_v53 = vrot.slane %v1091_v55, 4 }
 0xb33   :  { %v1093_v29 = vadd.f32 %v1092_v53, %v1091_v55 }
 0xb35   :  { %v1094_v21 = vrot.slane %v1093_v29, 2 }
 0xb37   :  { %v1095_v60 = vadd.f32 %v1094_v21, %v1093_v29 }
 0xb39   :  { %v1096_v4 = vrot.slane %v1095_v60, 1 }
 0xb3b   :  { %v1097_v14 = vadd.f32 %v1096_v4, %v1095_v60 }
 0xb44   :  { %v1075_v56 = vpop.permute.xlu1 %1074 }
 0xb45   :  { %v1082_v57 = vmul.f32 %v1367_v31, %v1075_v56 }
 0xb47   :  { %v1084_v58 = vsel %vm64_vm1, %v1082_v57, 0.0 }
 0xb48   :  { %v1085_v59 = vrot.slane %v1084_v58, 4 }
 0xb4a   :  { %v1086_v6 = vadd.f32 %v1085_v59, %v1084_v58 }
 0xb4c   :  { %v1087_v2 = vrot.slane %v1086_v6, 2 }
 0xb4e   :  { %v1088_v22 = vadd.f32 %v1087_v2, %v1086_v6 }
 0xb50   :  { %v1089_v9 = vrot.slane %v1088_v22, 1 }
 0xb52   :  { %v1090_v12 = vadd.f32 %v1089_v9, %v1088_v22 }
 0xb54   :  { %v1162_v1 = vsel %vm157_vm3, %v1097_v14, %v1090_v12 }
 0xb55   :  { %1163 = vrot.lane.b32.xlu2 %v1162_v1, %s1396_s22 }
 0xbaf   :  { %v1164_v37 = vpop.permute.xlu2 %1163 }
 0xbb0   :  { %v1167_v8 = vsel %vm64_vm1, %v1166_v5, %v1164_v37 }
 0xbb1   :  { %1204 = vmatmul.f32.vlgmr.msrb.gmra.mxu2 %v1167_v8 }
 0xc34   :  { %v1205_v10 = vpop.f32.mrf.mxu2 }
 0xc35   :  { %v1206_v11 = vadd.f32 %v1331_v7, %v1205_v10 }
 0xc37   :  { %v1208_v13 = vmax.f32 %v1206_v11, 0.0 }
 0xc39   :  { %1306 = vmatmul.msk.f32.vlgmr.msra.gmra.mxu0 %vm286_vm2, %v1208_v13 }
 0xcb6   :  { %v1235_v20 = vpop.f32.mrf.mxu0 }
 0xcb7   :  { %v1236_v51 = vadd.f32 %v1332_v19, %v1235_v20 }
 0xcb9   :  { %1239 = vst.msk [vmem:[#allocation2 + $0x6] sm:$0x3] %vm392_vm13, %v1236_v51 }
 0xcc0   :  { %v1240_v38 = vld [vmem:[#allocation2] sm:$0xff] }
 0xcc1   :  { %1307 = vmatmul.msk.f32.vlgmr.msrb.gmra.mxu1 %vm106_vm0, %v1240_v38 }
 0xd3e   :  { %v1269_v41 = vpop.f32.mrf.mxu1 }
 0xd3f   :  { %v1270_v61 = vadd.f32 %v1333_v40, %v1269_v41 }
 0xd41   :  { %1272 = vst.msk [vmem:[#allocation3] sm:$0xff] %vm64_vm1, %v1270_v61 }
 0xd42   :  { %1283 = dma.vmem_to_hbm [thread:$0]  %s1279_s5, 128, %s1281_s12, [#allocation4]  }
 0xd43   :  { %1392 = dma.done.wait [#allocation4], 128  }
 0xd44   :  { %1393 = vsyncadd [#allocation4], 4294967168 }
 0xd45   :  { %1288 = vsyncpa [#allocation4], 1 }

</bundles_post_ra>
